<compile_context>
chip_gen: v5e
topology: v5e:2x2
jax: 0.10.0
libtpu: 0.0.40
codegen_flags: <defaults>
</compile_context>

<pallas_src>
import functools

import jax
import jax.numpy as jnp
from jax.experimental import pallas as pl
from jax.experimental.pallas import tpu as pltpu


# ----------------------------------------------------------------------------
# Fused multi-layer LSTM kernel.
#
# refs layout (positional, per pallas_call convention):
#   inputs : x_ref (T, B, D)
#            then per layer: wih_ref (D_in, 4H), whh_ref (H, 4H), b_ref (1, 4H)
#   outputs: out_ref (B, H)            -- last hidden state of the top layer
#   scratch: seq buffer (T, B, H)      -- only if num_layers > 1
#            gx buffer  (T, B, 4H)     -- hoisted input projections, lane-dense
# Gate lane order matches PyTorch: [i, f, g, o].
# ----------------------------------------------------------------------------
def fused_lstm_kernel(*refs, num_layers):
    n_in = 1 + 3 * num_layers
    x_ref = refs[0]
    w_refs = refs[1:n_in]
    out_ref = refs[n_in]
    scratch = refs[n_in + 1:]

    n_seq = 0 if num_layers == 1 else 1
    seq_ref = scratch[0] if n_seq else None
    gx_ref = scratch[n_seq]

    T, B, G = gx_ref.shape
    H = G // 4
    unroll = True if T <= 32 else 8

    # Per-lane constants implementing sigmoid(x) = 0.5*tanh(0.5*x) + 0.5 on the
    # i/f/o lanes and plain tanh on the g lanes -> a single EUP push covers all
    # four gate activations of the (B, 4H) pre-activation.  Hoisted out of all
    # loops (JAX does not CSE broadcasts).
    lane = jax.lax.broadcasted_iota(jnp.int32, (B, G), 1)
    is_g = jnp.logical_and(lane >= 2 * H, lane < 3 * H)
    pre_scale = jnp.where(is_g, 1.0, 0.5).astype(jnp.float32)   # also the post-mul
    post_add = jnp.where(is_g, 0.0, 0.5).astype(jnp.float32)

    h_last = None
    for layer in range(num_layers):
        wih_ref = w_refs[3 * layer + 0]
        whh_ref = w_refs[3 * layer + 1]
        b_ref = w_refs[3 * layer + 2]

        in_seq_ref = x_ref if layer == 0 else seq_ref
        out_seq_ref = seq_ref if layer < num_layers - 1 else None

        # ------------------------------------------------------------------
        # Phase 1: input projection for all timesteps, hoisted OUT of the
        # recurrence.  One matmul + ONE lane-dense (B, 4H) store per timestep
        # into the single gx buffer (bias folded in, broadcast hoisted).
        # ------------------------------------------------------------------
        wih = wih_ref[...]                                      # (D_in, 4H)
        bias = jnp.broadcast_to(b_ref[...], (B, G))             # hoisted broadcast

        def project(t, carry, in_seq_ref=in_seq_ref, wih=wih, bias=bias):
            gx_ref[t] = jnp.dot(in_seq_ref[t], wih,
                                preferred_element_type=jnp.float32) + bias
            return carry

        jax.lax.fori_loop(0, T, project, 0, unroll=unroll)

        # ------------------------------------------------------------------
        # Phase 2: the serial recurrence.  Per step: one (B,H)@(H,4H) MXU
        # push, one lane-dense (B,4H) load, one full-width tanh (all gates)
        # plus one tanh for the cell state.  h/c stay loop-carried in vregs.
        # ------------------------------------------------------------------
        whh = whh_ref[...]                                      # (H, 4H)

        def step(t, carry, whh=whh, out_seq_ref=out_seq_ref):
            h, c = carry
            pre = gx_ref[t] + jnp.dot(h, whh,
                                      preferred_element_type=jnp.float32)  # (B,4H)
            t_all = jnp.tanh(pre * pre_scale)          # one EUP push, all gates
            gates = t_all * pre_scale + post_add       # sigmoid(i,f,o), tanh(g)
            i_g = gates[:, 0 * H:1 * H]
            f_g = gates[:, 1 * H:2 * H]
            g_g = gates[:, 2 * H:3 * H]
            o_g = gates[:, 3 * H:4 * H]
            c_new = f_g * c + i_g * g_g
            h_new = o_g * jnp.tanh(c_new)
            if out_seq_ref is not None:
                out_seq_ref[t] = h_new                 # next layer's input, VMEM only
            return (h_new, c_new)

        init = (jnp.zeros((B, H), jnp.float32), jnp.zeros((B, H), jnp.float32))
        h_last, _ = jax.lax.fori_loop(0, T, step, init, unroll=unroll)

    out_ref[...] = h_last


def _full_block_spec(arr):
    ndim = arr.ndim
    return pl.BlockSpec(tuple(arr.shape), lambda i, _n=ndim: (0,) * _n)


def fused_lstm_forward(x_tbd, params, hidden_size):
    """x_tbd: (T, B, D) time-major f32. Returns (B, H) last hidden of top layer."""
    T, B, _ = x_tbd.shape
    H = hidden_size
    num_layers = len(params)

    inputs = [x_tbd]
    for p in params:
        inputs += [p["w_ih_t"], p["w_hh_t"], p["bias"]]
    in_specs = [_full_block_spec(a) for a in inputs]

    n_seq = 0 if num_layers == 1 else 1
    scratch_shapes = ([pltpu.VMEM((T, B, H), jnp.float32)] * n_seq
                      + [pltpu.VMEM((T, B, 4 * H), jnp.float32)])

    kernel = functools.partial(fused_lstm_kernel, num_layers=num_layers)

    return pl.pallas_call(
        kernel,
        out_shape=jax.ShapeDtypeStruct((B, H), jnp.float32),
        grid=(1,),
        in_specs=in_specs,
        out_specs=pl.BlockSpec((B, H), lambda i: (0, 0)),
        scratch_shapes=scratch_shapes,
        compiler_params=pltpu.CompilerParams(
            dimension_semantics=("arbitrary",),
        ),
    )(*inputs)


# ----------------------------------------------------------------------------
# Model: parameters + forward (matches MultivariateRNNModel.forward semantics)
# ----------------------------------------------------------------------------
def init_params(key, input_dim, hidden_size, num_layers):
    """PyTorch-style LSTM init: U(-1/sqrt(H), 1/sqrt(H)), deterministic."""
    H = hidden_size
    bound = 1.0 / jnp.sqrt(jnp.float32(H))
    params = []
    for layer in range(num_layers):
        d_in = input_dim if layer == 0 else H
        key, k1, k2, k3, k4 = jax.random.split(key, 5)
        w_ih = jax.random.uniform(k1, (4 * H, d_in), jnp.float32, -bound, bound)
        w_hh = jax.random.uniform(k2, (4 * H, H), jnp.float32, -bound, bound)
        b_ih = jax.random.uniform(k3, (4 * H,), jnp.float32, -bound, bound)
        b_hh = jax.random.uniform(k4, (4 * H,), jnp.float32, -bound, bound)
        params.append(
            dict(
                w_ih_t=jnp.transpose(w_ih),               # (d_in, 4H)
                w_hh_t=jnp.transpose(w_hh),               # (H, 4H) lane-dense, fused gates
                bias=(b_ih + b_hh).reshape(1, 4 * H),     # (1, 4H) folded biases
            )
        )
    # TODO(synk): fc_layers (Linear/ReLU/Dropout/Linear) are defined in the
    # PyTorch __init__ but never used by forward(), so they are not built here.
    return params


@functools.partial(jax.jit, static_argnames=("hidden_size",))
def multivariate_rnn_forward(params, x, hidden_size):
    """x: (batch, seq, input_dim) batch-first. Returns (batch, hidden_size)."""
    x_tbd = jnp.transpose(x, (1, 0, 2)).astype(jnp.float32)   # time-major (T, B, D)
    return fused_lstm_forward(x_tbd, params, hidden_size)     # lstm_out[:, -1, :]


# ----------------------------------------------------------------------------
# Pure-JAX reference (lax.scan) for a correctness check.
# ----------------------------------------------------------------------------
def reference_forward(params, x, hidden_size):
    H = hidden_size
    h_seq = jnp.transpose(x, (1, 0, 2)).astype(jnp.float32)   # (T, B, D)
    B = h_seq.shape[1]
    for p in params:
        def step(carry, x_t, p=p):
            h, c = carry
            gates = x_t @ p["w_ih_t"] + h @ p["w_hh_t"] + p["bias"]
            i_g = jax.nn.sigmoid(gates[:, 0 * H:1 * H])
            f_g = jax.nn.sigmoid(gates[:, 1 * H:2 * H])
            g_g = jnp.tanh(gates[:, 2 * H:3 * H])
            o_g = jax.nn.sigmoid(gates[:, 3 * H:4 * H])
            c_new = f_g * c + i_g * g_g
            h_new = o_g * jnp.tanh(c_new)
            return (h_new, c_new), h_new

        init = (jnp.zeros((B, H), jnp.float32), jnp.zeros((B, H), jnp.float32))
        _, h_seq = jax.lax.scan(step, init, h_seq)
    return h_seq[-1]


if __name__ == "__main__":
    # Small shapes consistent with the module's forward.
    batch, seq, input_dim = 2, 8, 4
    hidden_size, num_layers = 32, 2

    key = jax.random.PRNGKey(0)
    key, pkey, xkey = jax.random.split(key, 3)

    params = init_params(pkey, input_dim, hidden_size, num_layers)
    x = jax.random.normal(xkey, (batch, seq, input_dim), jnp.float32)

    out = multivariate_rnn_forward(params, x, hidden_size)
    out = jax.block_until_ready(out)

    ref = reference_forward(params, x, hidden_size)
    assert out.shape == (batch, hidden_size)
    assert jnp.allclose(out, ref, rtol=1e-3, atol=1e-3), "mismatch vs reference"

    print("KERNEL_OK")
</pallas_src>

<mosaic_0001>
module attributes {stable_mosaic.version = 11 : i64} {
  func.func @fused_lstm_kernel(%arg0: i32, %arg1: memref<8x2x4xf32, #tpu.memory_space<vmem>>, %arg2: memref<4x128xf32, #tpu.memory_space<vmem>>, %arg3: memref<32x128xf32, #tpu.memory_space<vmem>>, %arg4: memref<1x128xf32, #tpu.memory_space<vmem>>, %arg5: memref<32x128xf32, #tpu.memory_space<vmem>>, %arg6: memref<32x128xf32, #tpu.memory_space<vmem>>, %arg7: memref<1x128xf32, #tpu.memory_space<vmem>>, %arg8: memref<2x32xf32, #tpu.memory_space<vmem>>, %arg9: memref<8x2x32xf32, #tpu.memory_space<vmem>>, %arg10: memref<8x2x128xf32, #tpu.memory_space<vmem>>) attributes {dimension_semantics = [#tpu.dimension_semantics<arbitrary>], iteration_bounds = array<i64: 1>, scalar_prefetch = 0 : i64, scratch_operands = 2 : i64, tpu.core_type = #tpu.core_type<tc>, window_params = [{pipeline_mode = #tpu.pipeline_mode<synchronous>, transform_indices = @transform_0, window_bounds = array<i64: 8, 2, 4>}, {pipeline_mode = #tpu.pipeline_mode<synchronous>, transform_indices = @transform_1, window_bounds = array<i64: 4, 128>}, {pipeline_mode = #tpu.pipeline_mode<synchronous>, transform_indices = @transform_2, window_bounds = array<i64: 32, 128>}, {pipeline_mode = #tpu.pipeline_mode<synchronous>, transform_indices = @transform_3, window_bounds = array<i64: 1, 128>}, {pipeline_mode = #tpu.pipeline_mode<synchronous>, transform_indices = @transform_4, window_bounds = array<i64: 32, 128>}, {pipeline_mode = #tpu.pipeline_mode<synchronous>, transform_indices = @transform_5, window_bounds = array<i64: 32, 128>}, {pipeline_mode = #tpu.pipeline_mode<synchronous>, transform_indices = @transform_6, window_bounds = array<i64: 1, 128>}, {pipeline_mode = #tpu.pipeline_mode<synchronous>, transform_indices = @transform_7, window_bounds = array<i64: 2, 32>}]} {
    %0 = tpu.iota {dimensions = array<i32: 1>} : vector<2x128xi32>
    %c64_i32 = arith.constant 64 : i32
    %1 = vector.broadcast %c64_i32 : i32 to vector<2x128xi32>
    %2 = arith.cmpi sge, %0, %1 : vector<2x128xi32>
    %c96_i32 = arith.constant 96 : i32
    %3 = vector.broadcast %c96_i32 : i32 to vector<2x128xi32>
    %4 = arith.cmpi slt, %0, %3 : vector<2x128xi32>
    %5 = arith.andi %2, %4 : vector<2x128xi1>
    %cst = arith.constant 1.000000e+00 : f32
    %cst_0 = arith.constant 5.000000e-01 : f32
    %6 = vector.broadcast %cst : f32 to vector<2x128xf32>
    %7 = vector.broadcast %cst_0 : f32 to vector<2x128xf32>
    %8 = arith.select %5, %6, %7 : vector<2x128xi1>, vector<2x128xf32>
    %cst_1 = arith.constant 0.000000e+00 : f32
    %cst_2 = arith.constant 5.000000e-01 : f32
    %9 = vector.broadcast %cst_1 : f32 to vector<2x128xf32>
    %10 = vector.broadcast %cst_2 : f32 to vector<2x128xf32>
    %11 = arith.select %5, %9, %10 : vector<2x128xi1>, vector<2x128xf32>
    %c0 = arith.constant 0 : index
    %c0_3 = arith.constant 0 : index
    %12 = vector.load %arg2[%c0, %c0_3] : memref<4x128xf32, #tpu.memory_space<vmem>>, vector<4x128xf32>
    %c0_4 = arith.constant 0 : index
    %c0_5 = arith.constant 0 : index
    %13 = vector.load %arg4[%c0_4, %c0_5] : memref<1x128xf32, #tpu.memory_space<vmem>>, vector<1x128xf32>
    %14 = vector.shape_cast %13 : vector<1x128xf32> to vector<1x128xf32>
    %15 = vector.broadcast %14 : vector<1x128xf32> to vector<2x128xf32>
    %c0_i32 = arith.constant 0 : i32
    %16 = arith.index_cast %c0_i32 : i32 to index
    %c0_6 = arith.constant 0 : index
    %c0_7 = arith.constant 0 : index
    %17 = vector.load %arg1[%16, %c0_6, %c0_7] : memref<8x2x4xf32, #tpu.memory_space<vmem>>, vector<1x2x4xf32>
    %18 = vector.shape_cast %17 : vector<1x2x4xf32> to vector<2x4xf32>
    %cst_8 = arith.constant dense<0.000000e+00> : vector<2x128xf32>
    %19 = tpu.matmul %18, %12, %cst_8 {dimension_numbers = #tpu.dot_dimension_numbers<[1], [0], [0], [1], [0, 0, 1, 1], [], []>} : vector<2x4xf32>, vector<4x128xf32>, vector<2x128xf32> -> vector<2x128xf32>
    %20 = arith.addf %19, %15 : vector<2x128xf32>
    %21 = arith.index_cast %c0_i32 : i32 to index
    %c0_9 = arith.constant 0 : index
    %c0_10 = arith.constant 0 : index
    %22 = vector.load %arg10[%21, %c0_9, %c0_10] : memref<8x2x128xf32, #tpu.memory_space<vmem>>, vector<1x2x128xf32>
    %23 = vector.shape_cast %22 : vector<1x2x128xf32> to vector<2x128xf32>
    %24 = vector.shape_cast %20 : vector<2x128xf32> to vector<1x2x128xf32>
    tpu.vector_store %arg10[%21, %c0_9, %c0_10], %24 {strides = array<i32>} : memref<8x2x128xf32, #tpu.memory_space<vmem>>, vector<1x2x128xf32>,
    %c1_i32 = arith.constant 1 : i32
    %25 = arith.index_cast %c1_i32 : i32 to index
    %c0_11 = arith.constant 0 : index
    %c0_12 = arith.constant 0 : index
    %26 = vector.load %arg1[%25, %c0_11, %c0_12] : memref<8x2x4xf32, #tpu.memory_space<vmem>>, vector<1x2x4xf32>
    %27 = vector.shape_cast %26 : vector<1x2x4xf32> to vector<2x4xf32>
    %cst_13 = arith.constant dense<0.000000e+00> : vector<2x128xf32>
    %28 = tpu.matmul %27, %12, %cst_13 {dimension_numbers = #tpu.dot_dimension_numbers<[1], [0], [0], [1], [0, 0, 1, 1], [], []>} : vector<2x4xf32>, vector<4x128xf32>, vector<2x128xf32> -> vector<2x128xf32>
    %29 = arith.addf %28, %15 : vector<2x128xf32>
    %30 = arith.index_cast %c1_i32 : i32 to index
    %c0_14 = arith.constant 0 : index
    %c0_15 = arith.constant 0 : index
    %31 = vector.load %arg10[%30, %c0_14, %c0_15] : memref<8x2x128xf32, #tpu.memory_space<vmem>>, vector<1x2x128xf32>
    %32 = vector.shape_cast %31 : vector<1x2x128xf32> to vector<2x128xf32>
    %33 = vector.shape_cast %29 : vector<2x128xf32> to vector<1x2x128xf32>
    tpu.vector_store %arg10[%30, %c0_14, %c0_15], %33 {strides = array<i32>} : memref<8x2x128xf32, #tpu.memory_space<vmem>>, vector<1x2x128xf32>,
    %c2_i32 = arith.constant 2 : i32
    %34 = arith.index_cast %c2_i32 : i32 to index
    %c0_16 = arith.constant 0 : index
    %c0_17 = arith.constant 0 : index
    %35 = vector.load %arg1[%34, %c0_16, %c0_17] : memref<8x2x4xf32, #tpu.memory_space<vmem>>, vector<1x2x4xf32>
    %36 = vector.shape_cast %35 : vector<1x2x4xf32> to vector<2x4xf32>
    %cst_18 = arith.constant dense<0.000000e+00> : vector<2x128xf32>
    %37 = tpu.matmul %36, %12, %cst_18 {dimension_numbers = #tpu.dot_dimension_numbers<[1], [0], [0], [1], [0, 0, 1, 1], [], []>} : vector<2x4xf32>, vector<4x128xf32>, vector<2x128xf32> -> vector<2x128xf32>
    %38 = arith.addf %37, %15 : vector<2x128xf32>
    %39 = arith.index_cast %c2_i32 : i32 to index
    %c0_19 = arith.constant 0 : index
    %c0_20 = arith.constant 0 : index
    %40 = vector.load %arg10[%39, %c0_19, %c0_20] : memref<8x2x128xf32, #tpu.memory_space<vmem>>, vector<1x2x128xf32>
    %41 = vector.shape_cast %40 : vector<1x2x128xf32> to vector<2x128xf32>
    %42 = vector.shape_cast %38 : vector<2x128xf32> to vector<1x2x128xf32>
    tpu.vector_store %arg10[%39, %c0_19, %c0_20], %42 {strides = array<i32>} : memref<8x2x128xf32, #tpu.memory_space<vmem>>, vector<1x2x128xf32>,
    %c3_i32 = arith.constant 3 : i32
    %43 = arith.index_cast %c3_i32 : i32 to index
    %c0_21 = arith.constant 0 : index
    %c0_22 = arith.constant 0 : index
    %44 = vector.load %arg1[%43, %c0_21, %c0_22] : memref<8x2x4xf32, #tpu.memory_space<vmem>>, vector<1x2x4xf32>
    %45 = vector.shape_cast %44 : vector<1x2x4xf32> to vector<2x4xf32>
    %cst_23 = arith.constant dense<0.000000e+00> : vector<2x128xf32>
    %46 = tpu.matmul %45, %12, %cst_23 {dimension_numbers = #tpu.dot_dimension_numbers<[1], [0], [0], [1], [0, 0, 1, 1], [], []>} : vector<2x4xf32>, vector<4x128xf32>, vector<2x128xf32> -> vector<2x128xf32>
    %47 = arith.addf %46, %15 : vector<2x128xf32>
    %48 = arith.index_cast %c3_i32 : i32 to index
    %c0_24 = arith.constant 0 : index
    %c0_25 = arith.constant 0 : index
    %49 = vector.load %arg10[%48, %c0_24, %c0_25] : memref<8x2x128xf32, #tpu.memory_space<vmem>>, vector<1x2x128xf32>
    %50 = vector.shape_cast %49 : vector<1x2x128xf32> to vector<2x128xf32>
    %51 = vector.shape_cast %47 : vector<2x128xf32> to vector<1x2x128xf32>
    tpu.vector_store %arg10[%48, %c0_24, %c0_25], %51 {strides = array<i32>} : memref<8x2x128xf32, #tpu.memory_space<vmem>>, vector<1x2x128xf32>,
    %c4_i32 = arith.constant 4 : i32
    %52 = arith.index_cast %c4_i32 : i32 to index
    %c0_26 = arith.constant 0 : index
    %c0_27 = arith.constant 0 : index
    %53 = vector.load %arg1[%52, %c0_26, %c0_27] : memref<8x2x4xf32, #tpu.memory_space<vmem>>, vector<1x2x4xf32>
    %54 = vector.shape_cast %53 : vector<1x2x4xf32> to vector<2x4xf32>
    %cst_28 = arith.constant dense<0.000000e+00> : vector<2x128xf32>
    %55 = tpu.matmul %54, %12, %cst_28 {dimension_numbers = #tpu.dot_dimension_numbers<[1], [0], [0], [1], [0, 0, 1, 1], [], []>} : vector<2x4xf32>, vector<4x128xf32>, vector<2x128xf32> -> vector<2x128xf32>
    %56 = arith.addf %55, %15 : vector<2x128xf32>
    %57 = arith.index_cast %c4_i32 : i32 to index
    %c0_29 = arith.constant 0 : index
    %c0_30 = arith.constant 0 : index
    %58 = vector.load %arg10[%57, %c0_29, %c0_30] : memref<8x2x128xf32, #tpu.memory_space<vmem>>, vector<1x2x128xf32>
    %59 = vector.shape_cast %58 : vector<1x2x128xf32> to vector<2x128xf32>
    %60 = vector.shape_cast %56 : vector<2x128xf32> to vector<1x2x128xf32>
    tpu.vector_store %arg10[%57, %c0_29, %c0_30], %60 {strides = array<i32>} : memref<8x2x128xf32, #tpu.memory_space<vmem>>, vector<1x2x128xf32>,
    %c5_i32 = arith.constant 5 : i32
    %61 = arith.index_cast %c5_i32 : i32 to index
    %c0_31 = arith.constant 0 : index
    %c0_32 = arith.constant 0 : index
    %62 = vector.load %arg1[%61, %c0_31, %c0_32] : memref<8x2x4xf32, #tpu.memory_space<vmem>>, vector<1x2x4xf32>
    %63 = vector.shape_cast %62 : vector<1x2x4xf32> to vector<2x4xf32>
    %cst_33 = arith.constant dense<0.000000e+00> : vector<2x128xf32>
    %64 = tpu.matmul %63, %12, %cst_33 {dimension_numbers = #tpu.dot_dimension_numbers<[1], [0], [0], [1], [0, 0, 1, 1], [], []>} : vector<2x4xf32>, vector<4x128xf32>, vector<2x128xf32> -> vector<2x128xf32>
    %65 = arith.addf %64, %15 : vector<2x128xf32>
    %66 = arith.index_cast %c5_i32 : i32 to index
    %c0_34 = arith.constant 0 : index
    %c0_35 = arith.constant 0 : index
    %67 = vector.load %arg10[%66, %c0_34, %c0_35] : memref<8x2x128xf32, #tpu.memory_space<vmem>>, vector<1x2x128xf32>
    %68 = vector.shape_cast %67 : vector<1x2x128xf32> to vector<2x128xf32>
    %69 = vector.shape_cast %65 : vector<2x128xf32> to vector<1x2x128xf32>
    tpu.vector_store %arg10[%66, %c0_34, %c0_35], %69 {strides = array<i32>} : memref<8x2x128xf32, #tpu.memory_space<vmem>>, vector<1x2x128xf32>,
    %c6_i32 = arith.constant 6 : i32
    %70 = arith.index_cast %c6_i32 : i32 to index
    %c0_36 = arith.constant 0 : index
    %c0_37 = arith.constant 0 : index
    %71 = vector.load %arg1[%70, %c0_36, %c0_37] : memref<8x2x4xf32, #tpu.memory_space<vmem>>, vector<1x2x4xf32>
    %72 = vector.shape_cast %71 : vector<1x2x4xf32> to vector<2x4xf32>
    %cst_38 = arith.constant dense<0.000000e+00> : vector<2x128xf32>
    %73 = tpu.matmul %72, %12, %cst_38 {dimension_numbers = #tpu.dot_dimension_numbers<[1], [0], [0], [1], [0, 0, 1, 1], [], []>} : vector<2x4xf32>, vector<4x128xf32>, vector<2x128xf32> -> vector<2x128xf32>
    %74 = arith.addf %73, %15 : vector<2x128xf32>
    %75 = arith.index_cast %c6_i32 : i32 to index
    %c0_39 = arith.constant 0 : index
    %c0_40 = arith.constant 0 : index
    %76 = vector.load %arg10[%75, %c0_39, %c0_40] : memref<8x2x128xf32, #tpu.memory_space<vmem>>, vector<1x2x128xf32>
    %77 = vector.shape_cast %76 : vector<1x2x128xf32> to vector<2x128xf32>
    %78 = vector.shape_cast %74 : vector<2x128xf32> to vector<1x2x128xf32>
    tpu.vector_store %arg10[%75, %c0_39, %c0_40], %78 {strides = array<i32>} : memref<8x2x128xf32, #tpu.memory_space<vmem>>, vector<1x2x128xf32>,
    %c7_i32 = arith.constant 7 : i32
    %79 = arith.index_cast %c7_i32 : i32 to index
    %c0_41 = arith.constant 0 : index
    %c0_42 = arith.constant 0 : index
    %80 = vector.load %arg1[%79, %c0_41, %c0_42] : memref<8x2x4xf32, #tpu.memory_space<vmem>>, vector<1x2x4xf32>
    %81 = vector.shape_cast %80 : vector<1x2x4xf32> to vector<2x4xf32>
    %cst_43 = arith.constant dense<0.000000e+00> : vector<2x128xf32>
    %82 = tpu.matmul %81, %12, %cst_43 {dimension_numbers = #tpu.dot_dimension_numbers<[1], [0], [0], [1], [0, 0, 1, 1], [], []>} : vector<2x4xf32>, vector<4x128xf32>, vector<2x128xf32> -> vector<2x128xf32>
    %83 = arith.addf %82, %15 : vector<2x128xf32>
    %84 = arith.index_cast %c7_i32 : i32 to index
    %c0_44 = arith.constant 0 : index
    %c0_45 = arith.constant 0 : index
    %85 = vector.load %arg10[%84, %c0_44, %c0_45] : memref<8x2x128xf32, #tpu.memory_space<vmem>>, vector<1x2x128xf32>
    %86 = vector.shape_cast %85 : vector<1x2x128xf32> to vector<2x128xf32>
    %87 = vector.shape_cast %83 : vector<2x128xf32> to vector<1x2x128xf32>
    tpu.vector_store %arg10[%84, %c0_44, %c0_45], %87 {strides = array<i32>} : memref<8x2x128xf32, #tpu.memory_space<vmem>>, vector<1x2x128xf32>,
    %c8_i32 = arith.constant 8 : i32
    %c0_46 = arith.constant 0 : index
    %c0_47 = arith.constant 0 : index
    %88 = vector.load %arg3[%c0_46, %c0_47] : memref<32x128xf32, #tpu.memory_space<vmem>>, vector<32x128xf32>
    %cst_48 = arith.constant 0.000000e+00 : f32
    %89 = vector.broadcast %cst_48 : f32 to vector<2x32xf32>
    %cst_49 = arith.constant 0.000000e+00 : f32
    %90 = vector.broadcast %cst_49 : f32 to vector<2x32xf32>
    %c0_i32_50 = arith.constant 0 : i32
    %91 = arith.index_cast %c0_i32_50 : i32 to index
    %c0_51 = arith.constant 0 : index
    %c0_52 = arith.constant 0 : index
    %92 = vector.load %arg10[%91, %c0_51, %c0_52] : memref<8x2x128xf32, #tpu.memory_space<vmem>>, vector<1x2x128xf32>
    %93 = vector.shape_cast %92 : vector<1x2x128xf32> to vector<2x128xf32>
    %cst_53 = arith.constant dense<0.000000e+00> : vector<2x128xf32>
    %94 = tpu.matmul %89, %88, %cst_53 {dimension_numbers = #tpu.dot_dimension_numbers<[1], [0], [0], [1], [0, 0, 1, 1], [], []>} : vector<2x32xf32>, vector<32x128xf32>, vector<2x128xf32> -> vector<2x128xf32>
    %95 = arith.addf %93, %94 : vector<2x128xf32>
    %96 = arith.mulf %95, %8 : vector<2x128xf32>
    %97 = math.tanh %96 : vector<2x128xf32>
    %98 = arith.mulf %97, %8 : vector<2x128xf32>
    %99 = arith.addf %98, %11 : vector<2x128xf32>
    %100 = vector.extract_strided_slice %99 {offsets = [0, 0], sizes = [2, 32], strides = [1, 1]} : vector<2x128xf32> to vector<2x32xf32>
    %101 = vector.extract_strided_slice %99 {offsets = [0, 32], sizes = [2, 32], strides = [1, 1]} : vector<2x128xf32> to vector<2x32xf32>
    %102 = vector.extract_strided_slice %99 {offsets = [0, 64], sizes = [2, 32], strides = [1, 1]} : vector<2x128xf32> to vector<2x32xf32>
    %103 = vector.extract_strided_slice %99 {offsets = [0, 96], sizes = [2, 32], strides = [1, 1]} : vector<2x128xf32> to vector<2x32xf32>
    %104 = arith.mulf %101, %90 : vector<2x32xf32>
    %105 = arith.mulf %100, %102 : vector<2x32xf32>
    %106 = arith.addf %104, %105 : vector<2x32xf32>
    %107 = math.tanh %106 : vector<2x32xf32>
    %108 = arith.mulf %103, %107 : vector<2x32xf32>
    %109 = arith.index_cast %c0_i32_50 : i32 to index
    %c0_54 = arith.constant 0 : index
    %c0_55 = arith.constant 0 : index
    %110 = vector.load %arg9[%109, %c0_54, %c0_55] : memref<8x2x32xf32, #tpu.memory_space<vmem>>, vector<1x2x32xf32>
    %111 = vector.shape_cast %110 : vector<1x2x32xf32> to vector<2x32xf32>
    %112 = vector.shape_cast %108 : vector<2x32xf32> to vector<1x2x32xf32>
    tpu.vector_store %arg9[%109, %c0_54, %c0_55], %112 {strides = array<i32>} : memref<8x2x32xf32, #tpu.memory_space<vmem>>, vector<1x2x32xf32>,
    %c1_i32_56 = arith.constant 1 : i32
    %113 = arith.index_cast %c1_i32_56 : i32 to index
    %c0_57 = arith.constant 0 : index
    %c0_58 = arith.constant 0 : index
    %114 = vector.load %arg10[%113, %c0_57, %c0_58] : memref<8x2x128xf32, #tpu.memory_space<vmem>>, vector<1x2x128xf32>
    %115 = vector.shape_cast %114 : vector<1x2x128xf32> to vector<2x128xf32>
    %cst_59 = arith.constant dense<0.000000e+00> : vector<2x128xf32>
    %116 = tpu.matmul %108, %88, %cst_59 {dimension_numbers = #tpu.dot_dimension_numbers<[1], [0], [0], [1], [0, 0, 1, 1], [], []>} : vector<2x32xf32>, vector<32x128xf32>, vector<2x128xf32> -> vector<2x128xf32>
    %117 = arith.addf %115, %116 : vector<2x128xf32>
    %118 = arith.mulf %117, %8 : vector<2x128xf32>
    %119 = math.tanh %118 : vector<2x128xf32>
    %120 = arith.mulf %119, %8 : vector<2x128xf32>
    %121 = arith.addf %120, %11 : vector<2x128xf32>
    %122 = vector.extract_strided_slice %121 {offsets = [0, 0], sizes = [2, 32], strides = [1, 1]} : vector<2x128xf32> to vector<2x32xf32>
    %123 = vector.extract_strided_slice %121 {offsets = [0, 32], sizes = [2, 32], strides = [1, 1]} : vector<2x128xf32> to vector<2x32xf32>
    %124 = vector.extract_strided_slice %121 {offsets = [0, 64], sizes = [2, 32], strides = [1, 1]} : vector<2x128xf32> to vector<2x32xf32>
    %125 = vector.extract_strided_slice %121 {offsets = [0, 96], sizes = [2, 32], strides = [1, 1]} : vector<2x128xf32> to vector<2x32xf32>
    %126 = arith.mulf %123, %106 : vector<2x32xf32>
    %127 = arith.mulf %122, %124 : vector<2x32xf32>
    %128 = arith.addf %126, %127 : vector<2x32xf32>
    %129 = math.tanh %128 : vector<2x32xf32>
    %130 = arith.mulf %125, %129 : vector<2x32xf32>
    %131 = arith.index_cast %c1_i32_56 : i32 to index
    %c0_60 = arith.constant 0 : index
    %c0_61 = arith.constant 0 : index
    %132 = vector.load %arg9[%131, %c0_60, %c0_61] : memref<8x2x32xf32, #tpu.memory_space<vmem>>, vector<1x2x32xf32>
    %133 = vector.shape_cast %132 : vector<1x2x32xf32> to vector<2x32xf32>
    %134 = vector.shape_cast %130 : vector<2x32xf32> to vector<1x2x32xf32>
    tpu.vector_store %arg9[%131, %c0_60, %c0_61], %134 {strides = array<i32>} : memref<8x2x32xf32, #tpu.memory_space<vmem>>, vector<1x2x32xf32>,
    %c2_i32_62 = arith.constant 2 : i32
    %135 = arith.index_cast %c2_i32_62 : i32 to index
    %c0_63 = arith.constant 0 : index
    %c0_64 = arith.constant 0 : index
    %136 = vector.load %arg10[%135, %c0_63, %c0_64] : memref<8x2x128xf32, #tpu.memory_space<vmem>>, vector<1x2x128xf32>
    %137 = vector.shape_cast %136 : vector<1x2x128xf32> to vector<2x128xf32>
    %cst_65 = arith.constant dense<0.000000e+00> : vector<2x128xf32>
    %138 = tpu.matmul %130, %88, %cst_65 {dimension_numbers = #tpu.dot_dimension_numbers<[1], [0], [0], [1], [0, 0, 1, 1], [], []>} : vector<2x32xf32>, vector<32x128xf32>, vector<2x128xf32> -> vector<2x128xf32>
    %139 = arith.addf %137, %138 : vector<2x128xf32>
    %140 = arith.mulf %139, %8 : vector<2x128xf32>
    %141 = math.tanh %140 : vector<2x128xf32>
    %142 = arith.mulf %141, %8 : vector<2x128xf32>
    %143 = arith.addf %142, %11 : vector<2x128xf32>
    %144 = vector.extract_strided_slice %143 {offsets = [0, 0], sizes = [2, 32], strides = [1, 1]} : vector<2x128xf32> to vector<2x32xf32>
    %145 = vector.extract_strided_slice %143 {offsets = [0, 32], sizes = [2, 32], strides = [1, 1]} : vector<2x128xf32> to vector<2x32xf32>
    %146 = vector.extract_strided_slice %143 {offsets = [0, 64], sizes = [2, 32], strides = [1, 1]} : vector<2x128xf32> to vector<2x32xf32>
    %147 = vector.extract_strided_slice %143 {offsets = [0, 96], sizes = [2, 32], strides = [1, 1]} : vector<2x128xf32> to vector<2x32xf32>
    %148 = arith.mulf %145, %128 : vector<2x32xf32>
    %149 = arith.mulf %144, %146 : vector<2x32xf32>
    %150 = arith.addf %148, %149 : vector<2x32xf32>
    %151 = math.tanh %150 : vector<2x32xf32>
    %152 = arith.mulf %147, %151 : vector<2x32xf32>
    %153 = arith.index_cast %c2_i32_62 : i32 to index
    %c0_66 = arith.constant 0 : index
    %c0_67 = arith.constant 0 : index
    %154 = vector.load %arg9[%153, %c0_66, %c0_67] : memref<8x2x32xf32, #tpu.memory_space<vmem>>, vector<1x2x32xf32>
    %155 = vector.shape_cast %154 : vector<1x2x32xf32> to vector<2x32xf32>
    %156 = vector.shape_cast %152 : vector<2x32xf32> to vector<1x2x32xf32>
    tpu.vector_store %arg9[%153, %c0_66, %c0_67], %156 {strides = array<i32>} : memref<8x2x32xf32, #tpu.memory_space<vmem>>, vector<1x2x32xf32>,
    %c3_i32_68 = arith.constant 3 : i32
    %157 = arith.index_cast %c3_i32_68 : i32 to index
    %c0_69 = arith.constant 0 : index
    %c0_70 = arith.constant 0 : index
    %158 = vector.load %arg10[%157, %c0_69, %c0_70] : memref<8x2x128xf32, #tpu.memory_space<vmem>>, vector<1x2x128xf32>
    %159 = vector.shape_cast %158 : vector<1x2x128xf32> to vector<2x128xf32>
    %cst_71 = arith.constant dense<0.000000e+00> : vector<2x128xf32>
    %160 = tpu.matmul %152, %88, %cst_71 {dimension_numbers = #tpu.dot_dimension_numbers<[1], [0], [0], [1], [0, 0, 1, 1], [], []>} : vector<2x32xf32>, vector<32x128xf32>, vector<2x128xf32> -> vector<2x128xf32>
    %161 = arith.addf %159, %160 : vector<2x128xf32>
    %162 = arith.mulf %161, %8 : vector<2x128xf32>
    %163 = math.tanh %162 : vector<2x128xf32>
    %164 = arith.mulf %163, %8 : vector<2x128xf32>
    %165 = arith.addf %164, %11 : vector<2x128xf32>
    %166 = vector.extract_strided_slice %165 {offsets = [0, 0], sizes = [2, 32], strides = [1, 1]} : vector<2x128xf32> to vector<2x32xf32>
    %167 = vector.extract_strided_slice %165 {offsets = [0, 32], sizes = [2, 32], strides = [1, 1]} : vector<2x128xf32> to vector<2x32xf32>
    %168 = vector.extract_strided_slice %165 {offsets = [0, 64], sizes = [2, 32], strides = [1, 1]} : vector<2x128xf32> to vector<2x32xf32>
    %169 = vector.extract_strided_slice %165 {offsets = [0, 96], sizes = [2, 32], strides = [1, 1]} : vector<2x128xf32> to vector<2x32xf32>
    %170 = arith.mulf %167, %150 : vector<2x32xf32>
    %171 = arith.mulf %166, %168 : vector<2x32xf32>
    %172 = arith.addf %170, %171 : vector<2x32xf32>
    %173 = math.tanh %172 : vector<2x32xf32>
    %174 = arith.mulf %169, %173 : vector<2x32xf32>
    %175 = arith.index_cast %c3_i32_68 : i32 to index
    %c0_72 = arith.constant 0 : index
    %c0_73 = arith.constant 0 : index
    %176 = vector.load %arg9[%175, %c0_72, %c0_73] : memref<8x2x32xf32, #tpu.memory_space<vmem>>, vector<1x2x32xf32>
    %177 = vector.shape_cast %176 : vector<1x2x32xf32> to vector<2x32xf32>
    %178 = vector.shape_cast %174 : vector<2x32xf32> to vector<1x2x32xf32>
    tpu.vector_store %arg9[%175, %c0_72, %c0_73], %178 {strides = array<i32>} : memref<8x2x32xf32, #tpu.memory_space<vmem>>, vector<1x2x32xf32>,
    %c4_i32_74 = arith.constant 4 : i32
    %179 = arith.index_cast %c4_i32_74 : i32 to index
    %c0_75 = arith.constant 0 : index
    %c0_76 = arith.constant 0 : index
    %180 = vector.load %arg10[%179, %c0_75, %c0_76] : memref<8x2x128xf32, #tpu.memory_space<vmem>>, vector<1x2x128xf32>
    %181 = vector.shape_cast %180 : vector<1x2x128xf32> to vector<2x128xf32>
    %cst_77 = arith.constant dense<0.000000e+00> : vector<2x128xf32>
    %182 = tpu.matmul %174, %88, %cst_77 {dimension_numbers = #tpu.dot_dimension_numbers<[1], [0], [0], [1], [0, 0, 1, 1], [], []>} : vector<2x32xf32>, vector<32x128xf32>, vector<2x128xf32> -> vector<2x128xf32>
    %183 = arith.addf %181, %182 : vector<2x128xf32>
    %184 = arith.mulf %183, %8 : vector<2x128xf32>
    %185 = math.tanh %184 : vector<2x128xf32>
    %186 = arith.mulf %185, %8 : vector<2x128xf32>
    %187 = arith.addf %186, %11 : vector<2x128xf32>
    %188 = vector.extract_strided_slice %187 {offsets = [0, 0], sizes = [2, 32], strides = [1, 1]} : vector<2x128xf32> to vector<2x32xf32>
    %189 = vector.extract_strided_slice %187 {offsets = [0, 32], sizes = [2, 32], strides = [1, 1]} : vector<2x128xf32> to vector<2x32xf32>
    %190 = vector.extract_strided_slice %187 {offsets = [0, 64], sizes = [2, 32], strides = [1, 1]} : vector<2x128xf32> to vector<2x32xf32>
    %191 = vector.extract_strided_slice %187 {offsets = [0, 96], sizes = [2, 32], strides = [1, 1]} : vector<2x128xf32> to vector<2x32xf32>
    %192 = arith.mulf %189, %172 : vector<2x32xf32>
    %193 = arith.mulf %188, %190 : vector<2x32xf32>
    %194 = arith.addf %192, %193 : vector<2x32xf32>
    %195 = math.tanh %194 : vector<2x32xf32>
    %196 = arith.mulf %191, %195 : vector<2x32xf32>
    %197 = arith.index_cast %c4_i32_74 : i32 to index
    %c0_78 = arith.constant 0 : index
    %c0_79 = arith.constant 0 : index
    %198 = vector.load %arg9[%197, %c0_78, %c0_79] : memref<8x2x32xf32, #tpu.memory_space<vmem>>, vector<1x2x32xf32>
    %199 = vector.shape_cast %198 : vector<1x2x32xf32> to vector<2x32xf32>
    %200 = vector.shape_cast %196 : vector<2x32xf32> to vector<1x2x32xf32>
    tpu.vector_store %arg9[%197, %c0_78, %c0_79], %200 {strides = array<i32>} : memref<8x2x32xf32, #tpu.memory_space<vmem>>, vector<1x2x32xf32>,
    %c5_i32_80 = arith.constant 5 : i32
    %201 = arith.index_cast %c5_i32_80 : i32 to index
    %c0_81 = arith.constant 0 : index
    %c0_82 = arith.constant 0 : index
    %202 = vector.load %arg10[%201, %c0_81, %c0_82] : memref<8x2x128xf32, #tpu.memory_space<vmem>>, vector<1x2x128xf32>
    %203 = vector.shape_cast %202 : vector<1x2x128xf32> to vector<2x128xf32>
    %cst_83 = arith.constant dense<0.000000e+00> : vector<2x128xf32>
    %204 = tpu.matmul %196, %88, %cst_83 {dimension_numbers = #tpu.dot_dimension_numbers<[1], [0], [0], [1], [0, 0, 1, 1], [], []>} : vector<2x32xf32>, vector<32x128xf32>, vector<2x128xf32> -> vector<2x128xf32>
    %205 = arith.addf %203, %204 : vector<2x128xf32>
    %206 = arith.mulf %205, %8 : vector<2x128xf32>
    %207 = math.tanh %206 : vector<2x128xf32>
    %208 = arith.mulf %207, %8 : vector<2x128xf32>
    %209 = arith.addf %208, %11 : vector<2x128xf32>
    %210 = vector.extract_strided_slice %209 {offsets = [0, 0], sizes = [2, 32], strides = [1, 1]} : vector<2x128xf32> to vector<2x32xf32>
    %211 = vector.extract_strided_slice %209 {offsets = [0, 32], sizes = [2, 32], strides = [1, 1]} : vector<2x128xf32> to vector<2x32xf32>
    %212 = vector.extract_strided_slice %209 {offsets = [0, 64], sizes = [2, 32], strides = [1, 1]} : vector<2x128xf32> to vector<2x32xf32>
    %213 = vector.extract_strided_slice %209 {offsets = [0, 96], sizes = [2, 32], strides = [1, 1]} : vector<2x128xf32> to vector<2x32xf32>
    %214 = arith.mulf %211, %194 : vector<2x32xf32>
    %215 = arith.mulf %210, %212 : vector<2x32xf32>
    %216 = arith.addf %214, %215 : vector<2x32xf32>
    %217 = math.tanh %216 : vector<2x32xf32>
    %218 = arith.mulf %213, %217 : vector<2x32xf32>
    %219 = arith.index_cast %c5_i32_80 : i32 to index
    %c0_84 = arith.constant 0 : index
    %c0_85 = arith.constant 0 : index
    %220 = vector.load %arg9[%219, %c0_84, %c0_85] : memref<8x2x32xf32, #tpu.memory_space<vmem>>, vector<1x2x32xf32>
    %221 = vector.shape_cast %220 : vector<1x2x32xf32> to vector<2x32xf32>
    %222 = vector.shape_cast %218 : vector<2x32xf32> to vector<1x2x32xf32>
    tpu.vector_store %arg9[%219, %c0_84, %c0_85], %222 {strides = array<i32>} : memref<8x2x32xf32, #tpu.memory_space<vmem>>, vector<1x2x32xf32>,
    %c6_i32_86 = arith.constant 6 : i32
    %223 = arith.index_cast %c6_i32_86 : i32 to index
    %c0_87 = arith.constant 0 : index
    %c0_88 = arith.constant 0 : index
    %224 = vector.load %arg10[%223, %c0_87, %c0_88] : memref<8x2x128xf32, #tpu.memory_space<vmem>>, vector<1x2x128xf32>
    %225 = vector.shape_cast %224 : vector<1x2x128xf32> to vector<2x128xf32>
    %cst_89 = arith.constant dense<0.000000e+00> : vector<2x128xf32>
    %226 = tpu.matmul %218, %88, %cst_89 {dimension_numbers = #tpu.dot_dimension_numbers<[1], [0], [0], [1], [0, 0, 1, 1], [], []>} : vector<2x32xf32>, vector<32x128xf32>, vector<2x128xf32> -> vector<2x128xf32>
    %227 = arith.addf %225, %226 : vector<2x128xf32>
    %228 = arith.mulf %227, %8 : vector<2x128xf32>
    %229 = math.tanh %228 : vector<2x128xf32>
    %230 = arith.mulf %229, %8 : vector<2x128xf32>
    %231 = arith.addf %230, %11 : vector<2x128xf32>
    %232 = vector.extract_strided_slice %231 {offsets = [0, 0], sizes = [2, 32], strides = [1, 1]} : vector<2x128xf32> to vector<2x32xf32>
    %233 = vector.extract_strided_slice %231 {offsets = [0, 32], sizes = [2, 32], strides = [1, 1]} : vector<2x128xf32> to vector<2x32xf32>
    %234 = vector.extract_strided_slice %231 {offsets = [0, 64], sizes = [2, 32], strides = [1, 1]} : vector<2x128xf32> to vector<2x32xf32>
    %235 = vector.extract_strided_slice %231 {offsets = [0, 96], sizes = [2, 32], strides = [1, 1]} : vector<2x128xf32> to vector<2x32xf32>
    %236 = arith.mulf %233, %216 : vector<2x32xf32>
    %237 = arith.mulf %232, %234 : vector<2x32xf32>
    %238 = arith.addf %236, %237 : vector<2x32xf32>
    %239 = math.tanh %238 : vector<2x32xf32>
    %240 = arith.mulf %235, %239 : vector<2x32xf32>
    %241 = arith.index_cast %c6_i32_86 : i32 to index
    %c0_90 = arith.constant 0 : index
    %c0_91 = arith.constant 0 : index
    %242 = vector.load %arg9[%241, %c0_90, %c0_91] : memref<8x2x32xf32, #tpu.memory_space<vmem>>, vector<1x2x32xf32>
    %243 = vector.shape_cast %242 : vector<1x2x32xf32> to vector<2x32xf32>
    %244 = vector.shape_cast %240 : vector<2x32xf32> to vector<1x2x32xf32>
    tpu.vector_store %arg9[%241, %c0_90, %c0_91], %244 {strides = array<i32>} : memref<8x2x32xf32, #tpu.memory_space<vmem>>, vector<1x2x32xf32>,
    %c7_i32_92 = arith.constant 7 : i32
    %245 = arith.index_cast %c7_i32_92 : i32 to index
    %c0_93 = arith.constant 0 : index
    %c0_94 = arith.constant 0 : index
    %246 = vector.load %arg10[%245, %c0_93, %c0_94] : memref<8x2x128xf32, #tpu.memory_space<vmem>>, vector<1x2x128xf32>
    %247 = vector.shape_cast %246 : vector<1x2x128xf32> to vector<2x128xf32>
    %cst_95 = arith.constant dense<0.000000e+00> : vector<2x128xf32>
    %248 = tpu.matmul %240, %88, %cst_95 {dimension_numbers = #tpu.dot_dimension_numbers<[1], [0], [0], [1], [0, 0, 1, 1], [], []>} : vector<2x32xf32>, vector<32x128xf32>, vector<2x128xf32> -> vector<2x128xf32>
    %249 = arith.addf %247, %248 : vector<2x128xf32>
    %250 = arith.mulf %249, %8 : vector<2x128xf32>
    %251 = math.tanh %250 : vector<2x128xf32>
    %252 = arith.mulf %251, %8 : vector<2x128xf32>
    %253 = arith.addf %252, %11 : vector<2x128xf32>
    %254 = vector.extract_strided_slice %253 {offsets = [0, 0], sizes = [2, 32], strides = [1, 1]} : vector<2x128xf32> to vector<2x32xf32>
    %255 = vector.extract_strided_slice %253 {offsets = [0, 32], sizes = [2, 32], strides = [1, 1]} : vector<2x128xf32> to vector<2x32xf32>
    %256 = vector.extract_strided_slice %253 {offsets = [0, 64], sizes = [2, 32], strides = [1, 1]} : vector<2x128xf32> to vector<2x32xf32>
    %257 = vector.extract_strided_slice %253 {offsets = [0, 96], sizes = [2, 32], strides = [1, 1]} : vector<2x128xf32> to vector<2x32xf32>
    %258 = arith.mulf %255, %238 : vector<2x32xf32>
    %259 = arith.mulf %254, %256 : vector<2x32xf32>
    %260 = arith.addf %258, %259 : vector<2x32xf32>
    %261 = math.tanh %260 : vector<2x32xf32>
    %262 = arith.mulf %257, %261 : vector<2x32xf32>
    %263 = arith.index_cast %c7_i32_92 : i32 to index
    %c0_96 = arith.constant 0 : index
    %c0_97 = arith.constant 0 : index
    %264 = vector.load %arg9[%263, %c0_96, %c0_97] : memref<8x2x32xf32, #tpu.memory_space<vmem>>, vector<1x2x32xf32>
    %265 = vector.shape_cast %264 : vector<1x2x32xf32> to vector<2x32xf32>
    %266 = vector.shape_cast %262 : vector<2x32xf32> to vector<1x2x32xf32>
    tpu.vector_store %arg9[%263, %c0_96, %c0_97], %266 {strides = array<i32>} : memref<8x2x32xf32, #tpu.memory_space<vmem>>, vector<1x2x32xf32>,
    %c8_i32_98 = arith.constant 8 : i32
    %c0_99 = arith.constant 0 : index
    %c0_100 = arith.constant 0 : index
    %267 = vector.load %arg5[%c0_99, %c0_100] : memref<32x128xf32, #tpu.memory_space<vmem>>, vector<32x128xf32>
    %c0_101 = arith.constant 0 : index
    %c0_102 = arith.constant 0 : index
    %268 = vector.load %arg7[%c0_101, %c0_102] : memref<1x128xf32, #tpu.memory_space<vmem>>, vector<1x128xf32>
    %269 = vector.shape_cast %268 : vector<1x128xf32> to vector<1x128xf32>
    %270 = vector.broadcast %269 : vector<1x128xf32> to vector<2x128xf32>
    %c0_i32_103 = arith.constant 0 : i32
    %271 = arith.index_cast %c0_i32_103 : i32 to index
    %c0_104 = arith.constant 0 : index
    %c0_105 = arith.constant 0 : index
    %272 = vector.load %arg9[%271, %c0_104, %c0_105] : memref<8x2x32xf32, #tpu.memory_space<vmem>>, vector<1x2x32xf32>
    %273 = vector.shape_cast %272 : vector<1x2x32xf32> to vector<2x32xf32>
    %cst_106 = arith.constant dense<0.000000e+00> : vector<2x128xf32>
    %274 = tpu.matmul %273, %267, %cst_106 {dimension_numbers = #tpu.dot_dimension_numbers<[1], [0], [0], [1], [0, 0, 1, 1], [], []>} : vector<2x32xf32>, vector<32x128xf32>, vector<2x128xf32> -> vector<2x128xf32>
    %275 = arith.addf %274, %270 : vector<2x128xf32>
    %276 = arith.index_cast %c0_i32_103 : i32 to index
    %c0_107 = arith.constant 0 : index
    %c0_108 = arith.constant 0 : index
    %277 = vector.load %arg10[%276, %c0_107, %c0_108] : memref<8x2x128xf32, #tpu.memory_space<vmem>>, vector<1x2x128xf32>
    %278 = vector.shape_cast %277 : vector<1x2x128xf32> to vector<2x128xf32>
    %279 = vector.shape_cast %275 : vector<2x128xf32> to vector<1x2x128xf32>
    tpu.vector_store %arg10[%276, %c0_107, %c0_108], %279 {strides = array<i32>} : memref<8x2x128xf32, #tpu.memory_space<vmem>>, vector<1x2x128xf32>,
    %c1_i32_109 = arith.constant 1 : i32
    %280 = arith.index_cast %c1_i32_109 : i32 to index
    %c0_110 = arith.constant 0 : index
    %c0_111 = arith.constant 0 : index
    %281 = vector.load %arg9[%280, %c0_110, %c0_111] : memref<8x2x32xf32, #tpu.memory_space<vmem>>, vector<1x2x32xf32>
    %282 = vector.shape_cast %281 : vector<1x2x32xf32> to vector<2x32xf32>
    %cst_112 = arith.constant dense<0.000000e+00> : vector<2x128xf32>
    %283 = tpu.matmul %282, %267, %cst_112 {dimension_numbers = #tpu.dot_dimension_numbers<[1], [0], [0], [1], [0, 0, 1, 1], [], []>} : vector<2x32xf32>, vector<32x128xf32>, vector<2x128xf32> -> vector<2x128xf32>
    %284 = arith.addf %283, %270 : vector<2x128xf32>
    %285 = arith.index_cast %c1_i32_109 : i32 to index
    %c0_113 = arith.constant 0 : index
    %c0_114 = arith.constant 0 : index
    %286 = vector.load %arg10[%285, %c0_113, %c0_114] : memref<8x2x128xf32, #tpu.memory_space<vmem>>, vector<1x2x128xf32>
    %287 = vector.shape_cast %286 : vector<1x2x128xf32> to vector<2x128xf32>
    %288 = vector.shape_cast %284 : vector<2x128xf32> to vector<1x2x128xf32>
    tpu.vector_store %arg10[%285, %c0_113, %c0_114], %288 {strides = array<i32>} : memref<8x2x128xf32, #tpu.memory_space<vmem>>, vector<1x2x128xf32>,
    %c2_i32_115 = arith.constant 2 : i32
    %289 = arith.index_cast %c2_i32_115 : i32 to index
    %c0_116 = arith.constant 0 : index
    %c0_117 = arith.constant 0 : index
    %290 = vector.load %arg9[%289, %c0_116, %c0_117] : memref<8x2x32xf32, #tpu.memory_space<vmem>>, vector<1x2x32xf32>
    %291 = vector.shape_cast %290 : vector<1x2x32xf32> to vector<2x32xf32>
    %cst_118 = arith.constant dense<0.000000e+00> : vector<2x128xf32>
    %292 = tpu.matmul %291, %267, %cst_118 {dimension_numbers = #tpu.dot_dimension_numbers<[1], [0], [0], [1], [0, 0, 1, 1], [], []>} : vector<2x32xf32>, vector<32x128xf32>, vector<2x128xf32> -> vector<2x128xf32>
    %293 = arith.addf %292, %270 : vector<2x128xf32>
    %294 = arith.index_cast %c2_i32_115 : i32 to index
    %c0_119 = arith.constant 0 : index
    %c0_120 = arith.constant 0 : index
    %295 = vector.load %arg10[%294, %c0_119, %c0_120] : memref<8x2x128xf32, #tpu.memory_space<vmem>>, vector<1x2x128xf32>
    %296 = vector.shape_cast %295 : vector<1x2x128xf32> to vector<2x128xf32>
    %297 = vector.shape_cast %293 : vector<2x128xf32> to vector<1x2x128xf32>
    tpu.vector_store %arg10[%294, %c0_119, %c0_120], %297 {strides = array<i32>} : memref<8x2x128xf32, #tpu.memory_space<vmem>>, vector<1x2x128xf32>,
    %c3_i32_121 = arith.constant 3 : i32
    %298 = arith.index_cast %c3_i32_121 : i32 to index
    %c0_122 = arith.constant 0 : index
    %c0_123 = arith.constant 0 : index
    %299 = vector.load %arg9[%298, %c0_122, %c0_123] : memref<8x2x32xf32, #tpu.memory_space<vmem>>, vector<1x2x32xf32>
    %300 = vector.shape_cast %299 : vector<1x2x32xf32> to vector<2x32xf32>
    %cst_124 = arith.constant dense<0.000000e+00> : vector<2x128xf32>
    %301 = tpu.matmul %300, %267, %cst_124 {dimension_numbers = #tpu.dot_dimension_numbers<[1], [0], [0], [1], [0, 0, 1, 1], [], []>} : vector<2x32xf32>, vector<32x128xf32>, vector<2x128xf32> -> vector<2x128xf32>
    %302 = arith.addf %301, %270 : vector<2x128xf32>
    %303 = arith.index_cast %c3_i32_121 : i32 to index
    %c0_125 = arith.constant 0 : index
    %c0_126 = arith.constant 0 : index
    %304 = vector.load %arg10[%303, %c0_125, %c0_126] : memref<8x2x128xf32, #tpu.memory_space<vmem>>, vector<1x2x128xf32>
    %305 = vector.shape_cast %304 : vector<1x2x128xf32> to vector<2x128xf32>
    %306 = vector.shape_cast %302 : vector<2x128xf32> to vector<1x2x128xf32>
    tpu.vector_store %arg10[%303, %c0_125, %c0_126], %306 {strides = array<i32>} : memref<8x2x128xf32, #tpu.memory_space<vmem>>, vector<1x2x128xf32>,
    %c4_i32_127 = arith.constant 4 : i32
    %307 = arith.index_cast %c4_i32_127 : i32 to index
    %c0_128 = arith.constant 0 : index
    %c0_129 = arith.constant 0 : index
    %308 = vector.load %arg9[%307, %c0_128, %c0_129] : memref<8x2x32xf32, #tpu.memory_space<vmem>>, vector<1x2x32xf32>
    %309 = vector.shape_cast %308 : vector<1x2x32xf32> to vector<2x32xf32>
    %cst_130 = arith.constant dense<0.000000e+00> : vector<2x128xf32>
    %310 = tpu.matmul %309, %267, %cst_130 {dimension_numbers = #tpu.dot_dimension_numbers<[1], [0], [0], [1], [0, 0, 1, 1], [], []>} : vector<2x32xf32>, vector<32x128xf32>, vector<2x128xf32> -> vector<2x128xf32>
    %311 = arith.addf %310, %270 : vector<2x128xf32>
    %312 = arith.index_cast %c4_i32_127 : i32 to index
    %c0_131 = arith.constant 0 : index
    %c0_132 = arith.constant 0 : index
    %313 = vector.load %arg10[%312, %c0_131, %c0_132] : memref<8x2x128xf32, #tpu.memory_space<vmem>>, vector<1x2x128xf32>
    %314 = vector.shape_cast %313 : vector<1x2x128xf32> to vector<2x128xf32>
    %315 = vector.shape_cast %311 : vector<2x128xf32> to vector<1x2x128xf32>
    tpu.vector_store %arg10[%312, %c0_131, %c0_132], %315 {strides = array<i32>} : memref<8x2x128xf32, #tpu.memory_space<vmem>>, vector<1x2x128xf32>,
    %c5_i32_133 = arith.constant 5 : i32
    %316 = arith.index_cast %c5_i32_133 : i32 to index
    %c0_134 = arith.constant 0 : index
    %c0_135 = arith.constant 0 : index
    %317 = vector.load %arg9[%316, %c0_134, %c0_135] : memref<8x2x32xf32, #tpu.memory_space<vmem>>, vector<1x2x32xf32>
    %318 = vector.shape_cast %317 : vector<1x2x32xf32> to vector<2x32xf32>
    %cst_136 = arith.constant dense<0.000000e+00> : vector<2x128xf32>
    %319 = tpu.matmul %318, %267, %cst_136 {dimension_numbers = #tpu.dot_dimension_numbers<[1], [0], [0], [1], [0, 0, 1, 1], [], []>} : vector<2x32xf32>, vector<32x128xf32>, vector<2x128xf32> -> vector<2x128xf32>
    %320 = arith.addf %319, %270 : vector<2x128xf32>
    %321 = arith.index_cast %c5_i32_133 : i32 to index
    %c0_137 = arith.constant 0 : index
    %c0_138 = arith.constant 0 : index
    %322 = vector.load %arg10[%321, %c0_137, %c0_138] : memref<8x2x128xf32, #tpu.memory_space<vmem>>, vector<1x2x128xf32>
    %323 = vector.shape_cast %322 : vector<1x2x128xf32> to vector<2x128xf32>
    %324 = vector.shape_cast %320 : vector<2x128xf32> to vector<1x2x128xf32>
    tpu.vector_store %arg10[%321, %c0_137, %c0_138], %324 {strides = array<i32>} : memref<8x2x128xf32, #tpu.memory_space<vmem>>, vector<1x2x128xf32>,
    %c6_i32_139 = arith.constant 6 : i32
    %325 = arith.index_cast %c6_i32_139 : i32 to index
    %c0_140 = arith.constant 0 : index
    %c0_141 = arith.constant 0 : index
    %326 = vector.load %arg9[%325, %c0_140, %c0_141] : memref<8x2x32xf32, #tpu.memory_space<vmem>>, vector<1x2x32xf32>
    %327 = vector.shape_cast %326 : vector<1x2x32xf32> to vector<2x32xf32>
    %cst_142 = arith.constant dense<0.000000e+00> : vector<2x128xf32>
    %328 = tpu.matmul %327, %267, %cst_142 {dimension_numbers = #tpu.dot_dimension_numbers<[1], [0], [0], [1], [0, 0, 1, 1], [], []>} : vector<2x32xf32>, vector<32x128xf32>, vector<2x128xf32> -> vector<2x128xf32>
    %329 = arith.addf %328, %270 : vector<2x128xf32>
    %330 = arith.index_cast %c6_i32_139 : i32 to index
    %c0_143 = arith.constant 0 : index
    %c0_144 = arith.constant 0 : index
    %331 = vector.load %arg10[%330, %c0_143, %c0_144] : memref<8x2x128xf32, #tpu.memory_space<vmem>>, vector<1x2x128xf32>
    %332 = vector.shape_cast %331 : vector<1x2x128xf32> to vector<2x128xf32>
    %333 = vector.shape_cast %329 : vector<2x128xf32> to vector<1x2x128xf32>
    tpu.vector_store %arg10[%330, %c0_143, %c0_144], %333 {strides = array<i32>} : memref<8x2x128xf32, #tpu.memory_space<vmem>>, vector<1x2x128xf32>,
    %c7_i32_145 = arith.constant 7 : i32
    %334 = arith.index_cast %c7_i32_145 : i32 to index
    %c0_146 = arith.constant 0 : index
    %c0_147 = arith.constant 0 : index
    %335 = vector.load %arg9[%334, %c0_146, %c0_147] : memref<8x2x32xf32, #tpu.memory_space<vmem>>, vector<1x2x32xf32>
    %336 = vector.shape_cast %335 : vector<1x2x32xf32> to vector<2x32xf32>
    %cst_148 = arith.constant dense<0.000000e+00> : vector<2x128xf32>
    %337 = tpu.matmul %336, %267, %cst_148 {dimension_numbers = #tpu.dot_dimension_numbers<[1], [0], [0], [1], [0, 0, 1, 1], [], []>} : vector<2x32xf32>, vector<32x128xf32>, vector<2x128xf32> -> vector<2x128xf32>
    %338 = arith.addf %337, %270 : vector<2x128xf32>
    %339 = arith.index_cast %c7_i32_145 : i32 to index
    %c0_149 = arith.constant 0 : index
    %c0_150 = arith.constant 0 : index
    %340 = vector.load %arg10[%339, %c0_149, %c0_150] : memref<8x2x128xf32, #tpu.memory_space<vmem>>, vector<1x2x128xf32>
    %341 = vector.shape_cast %340 : vector<1x2x128xf32> to vector<2x128xf32>
    %342 = vector.shape_cast %338 : vector<2x128xf32> to vector<1x2x128xf32>
    tpu.vector_store %arg10[%339, %c0_149, %c0_150], %342 {strides = array<i32>} : memref<8x2x128xf32, #tpu.memory_space<vmem>>, vector<1x2x128xf32>,
    %c8_i32_151 = arith.constant 8 : i32
    %c0_152 = arith.constant 0 : index
    %c0_153 = arith.constant 0 : index
    %343 = vector.load %arg6[%c0_152, %c0_153] : memref<32x128xf32, #tpu.memory_space<vmem>>, vector<32x128xf32>
    %cst_154 = arith.constant 0.000000e+00 : f32
    %344 = vector.broadcast %cst_154 : f32 to vector<2x32xf32>
    %cst_155 = arith.constant 0.000000e+00 : f32
    %345 = vector.broadcast %cst_155 : f32 to vector<2x32xf32>
    %c0_i32_156 = arith.constant 0 : i32
    %346 = arith.index_cast %c0_i32_156 : i32 to index
    %c0_157 = arith.constant 0 : index
    %c0_158 = arith.constant 0 : index
    %347 = vector.load %arg10[%346, %c0_157, %c0_158] : memref<8x2x128xf32, #tpu.memory_space<vmem>>, vector<1x2x128xf32>
    %348 = vector.shape_cast %347 : vector<1x2x128xf32> to vector<2x128xf32>
    %cst_159 = arith.constant dense<0.000000e+00> : vector<2x128xf32>
    %349 = tpu.matmul %344, %343, %cst_159 {dimension_numbers = #tpu.dot_dimension_numbers<[1], [0], [0], [1], [0, 0, 1, 1], [], []>} : vector<2x32xf32>, vector<32x128xf32>, vector<2x128xf32> -> vector<2x128xf32>
    %350 = arith.addf %348, %349 : vector<2x128xf32>
    %351 = arith.mulf %350, %8 : vector<2x128xf32>
    %352 = math.tanh %351 : vector<2x128xf32>
    %353 = arith.mulf %352, %8 : vector<2x128xf32>
    %354 = arith.addf %353, %11 : vector<2x128xf32>
    %355 = vector.extract_strided_slice %354 {offsets = [0, 0], sizes = [2, 32], strides = [1, 1]} : vector<2x128xf32> to vector<2x32xf32>
    %356 = vector.extract_strided_slice %354 {offsets = [0, 32], sizes = [2, 32], strides = [1, 1]} : vector<2x128xf32> to vector<2x32xf32>
    %357 = vector.extract_strided_slice %354 {offsets = [0, 64], sizes = [2, 32], strides = [1, 1]} : vector<2x128xf32> to vector<2x32xf32>
    %358 = vector.extract_strided_slice %354 {offsets = [0, 96], sizes = [2, 32], strides = [1, 1]} : vector<2x128xf32> to vector<2x32xf32>
    %359 = arith.mulf %356, %345 : vector<2x32xf32>
    %360 = arith.mulf %355, %357 : vector<2x32xf32>
    %361 = arith.addf %359, %360 : vector<2x32xf32>
    %362 = math.tanh %361 : vector<2x32xf32>
    %363 = arith.mulf %358, %362 : vector<2x32xf32>
    %c1_i32_160 = arith.constant 1 : i32
    %364 = arith.index_cast %c1_i32_160 : i32 to index
    %c0_161 = arith.constant 0 : index
    %c0_162 = arith.constant 0 : index
    %365 = vector.load %arg10[%364, %c0_161, %c0_162] : memref<8x2x128xf32, #tpu.memory_space<vmem>>, vector<1x2x128xf32>
    %366 = vector.shape_cast %365 : vector<1x2x128xf32> to vector<2x128xf32>
    %cst_163 = arith.constant dense<0.000000e+00> : vector<2x128xf32>
    %367 = tpu.matmul %363, %343, %cst_163 {dimension_numbers = #tpu.dot_dimension_numbers<[1], [0], [0], [1], [0, 0, 1, 1], [], []>} : vector<2x32xf32>, vector<32x128xf32>, vector<2x128xf32> -> vector<2x128xf32>
    %368 = arith.addf %366, %367 : vector<2x128xf32>
    %369 = arith.mulf %368, %8 : vector<2x128xf32>
    %370 = math.tanh %369 : vector<2x128xf32>
    %371 = arith.mulf %370, %8 : vector<2x128xf32>
    %372 = arith.addf %371, %11 : vector<2x128xf32>
    %373 = vector.extract_strided_slice %372 {offsets = [0, 0], sizes = [2, 32], strides = [1, 1]} : vector<2x128xf32> to vector<2x32xf32>
    %374 = vector.extract_strided_slice %372 {offsets = [0, 32], sizes = [2, 32], strides = [1, 1]} : vector<2x128xf32> to vector<2x32xf32>
    %375 = vector.extract_strided_slice %372 {offsets = [0, 64], sizes = [2, 32], strides = [1, 1]} : vector<2x128xf32> to vector<2x32xf32>
    %376 = vector.extract_strided_slice %372 {offsets = [0, 96], sizes = [2, 32], strides = [1, 1]} : vector<2x128xf32> to vector<2x32xf32>
    %377 = arith.mulf %374, %361 : vector<2x32xf32>
    %378 = arith.mulf %373, %375 : vector<2x32xf32>
    %379 = arith.addf %377, %378 : vector<2x32xf32>
    %380 = math.tanh %379 : vector<2x32xf32>
    %381 = arith.mulf %376, %380 : vector<2x32xf32>
    %c2_i32_164 = arith.constant 2 : i32
    %382 = arith.index_cast %c2_i32_164 : i32 to index
    %c0_165 = arith.constant 0 : index
    %c0_166 = arith.constant 0 : index
    %383 = vector.load %arg10[%382, %c0_165, %c0_166] : memref<8x2x128xf32, #tpu.memory_space<vmem>>, vector<1x2x128xf32>
    %384 = vector.shape_cast %383 : vector<1x2x128xf32> to vector<2x128xf32>
    %cst_167 = arith.constant dense<0.000000e+00> : vector<2x128xf32>
    %385 = tpu.matmul %381, %343, %cst_167 {dimension_numbers = #tpu.dot_dimension_numbers<[1], [0], [0], [1], [0, 0, 1, 1], [], []>} : vector<2x32xf32>, vector<32x128xf32>, vector<2x128xf32> -> vector<2x128xf32>
    %386 = arith.addf %384, %385 : vector<2x128xf32>
    %387 = arith.mulf %386, %8 : vector<2x128xf32>
    %388 = math.tanh %387 : vector<2x128xf32>
    %389 = arith.mulf %388, %8 : vector<2x128xf32>
    %390 = arith.addf %389, %11 : vector<2x128xf32>
    %391 = vector.extract_strided_slice %390 {offsets = [0, 0], sizes = [2, 32], strides = [1, 1]} : vector<2x128xf32> to vector<2x32xf32>
    %392 = vector.extract_strided_slice %390 {offsets = [0, 32], sizes = [2, 32], strides = [1, 1]} : vector<2x128xf32> to vector<2x32xf32>
    %393 = vector.extract_strided_slice %390 {offsets = [0, 64], sizes = [2, 32], strides = [1, 1]} : vector<2x128xf32> to vector<2x32xf32>
    %394 = vector.extract_strided_slice %390 {offsets = [0, 96], sizes = [2, 32], strides = [1, 1]} : vector<2x128xf32> to vector<2x32xf32>
    %395 = arith.mulf %392, %379 : vector<2x32xf32>
    %396 = arith.mulf %391, %393 : vector<2x32xf32>
    %397 = arith.addf %395, %396 : vector<2x32xf32>
    %398 = math.tanh %397 : vector<2x32xf32>
    %399 = arith.mulf %394, %398 : vector<2x32xf32>
    %c3_i32_168 = arith.constant 3 : i32
    %400 = arith.index_cast %c3_i32_168 : i32 to index
    %c0_169 = arith.constant 0 : index
    %c0_170 = arith.constant 0 : index
    %401 = vector.load %arg10[%400, %c0_169, %c0_170] : memref<8x2x128xf32, #tpu.memory_space<vmem>>, vector<1x2x128xf32>
    %402 = vector.shape_cast %401 : vector<1x2x128xf32> to vector<2x128xf32>
    %cst_171 = arith.constant dense<0.000000e+00> : vector<2x128xf32>
    %403 = tpu.matmul %399, %343, %cst_171 {dimension_numbers = #tpu.dot_dimension_numbers<[1], [0], [0], [1], [0, 0, 1, 1], [], []>} : vector<2x32xf32>, vector<32x128xf32>, vector<2x128xf32> -> vector<2x128xf32>
    %404 = arith.addf %402, %403 : vector<2x128xf32>
    %405 = arith.mulf %404, %8 : vector<2x128xf32>
    %406 = math.tanh %405 : vector<2x128xf32>
    %407 = arith.mulf %406, %8 : vector<2x128xf32>
    %408 = arith.addf %407, %11 : vector<2x128xf32>
    %409 = vector.extract_strided_slice %408 {offsets = [0, 0], sizes = [2, 32], strides = [1, 1]} : vector<2x128xf32> to vector<2x32xf32>
    %410 = vector.extract_strided_slice %408 {offsets = [0, 32], sizes = [2, 32], strides = [1, 1]} : vector<2x128xf32> to vector<2x32xf32>
    %411 = vector.extract_strided_slice %408 {offsets = [0, 64], sizes = [2, 32], strides = [1, 1]} : vector<2x128xf32> to vector<2x32xf32>
    %412 = vector.extract_strided_slice %408 {offsets = [0, 96], sizes = [2, 32], strides = [1, 1]} : vector<2x128xf32> to vector<2x32xf32>
    %413 = arith.mulf %410, %397 : vector<2x32xf32>
    %414 = arith.mulf %409, %411 : vector<2x32xf32>
    %415 = arith.addf %413, %414 : vector<2x32xf32>
    %416 = math.tanh %415 : vector<2x32xf32>
    %417 = arith.mulf %412, %416 : vector<2x32xf32>
    %c4_i32_172 = arith.constant 4 : i32
    %418 = arith.index_cast %c4_i32_172 : i32 to index
    %c0_173 = arith.constant 0 : index
    %c0_174 = arith.constant 0 : index
    %419 = vector.load %arg10[%418, %c0_173, %c0_174] : memref<8x2x128xf32, #tpu.memory_space<vmem>>, vector<1x2x128xf32>
    %420 = vector.shape_cast %419 : vector<1x2x128xf32> to vector<2x128xf32>
    %cst_175 = arith.constant dense<0.000000e+00> : vector<2x128xf32>
    %421 = tpu.matmul %417, %343, %cst_175 {dimension_numbers = #tpu.dot_dimension_numbers<[1], [0], [0], [1], [0, 0, 1, 1], [], []>} : vector<2x32xf32>, vector<32x128xf32>, vector<2x128xf32> -> vector<2x128xf32>
    %422 = arith.addf %420, %421 : vector<2x128xf32>
    %423 = arith.mulf %422, %8 : vector<2x128xf32>
    %424 = math.tanh %423 : vector<2x128xf32>
    %425 = arith.mulf %424, %8 : vector<2x128xf32>
    %426 = arith.addf %425, %11 : vector<2x128xf32>
    %427 = vector.extract_strided_slice %426 {offsets = [0, 0], sizes = [2, 32], strides = [1, 1]} : vector<2x128xf32> to vector<2x32xf32>
    %428 = vector.extract_strided_slice %426 {offsets = [0, 32], sizes = [2, 32], strides = [1, 1]} : vector<2x128xf32> to vector<2x32xf32>
    %429 = vector.extract_strided_slice %426 {offsets = [0, 64], sizes = [2, 32], strides = [1, 1]} : vector<2x128xf32> to vector<2x32xf32>
    %430 = vector.extract_strided_slice %426 {offsets = [0, 96], sizes = [2, 32], strides = [1, 1]} : vector<2x128xf32> to vector<2x32xf32>
    %431 = arith.mulf %428, %415 : vector<2x32xf32>
    %432 = arith.mulf %427, %429 : vector<2x32xf32>
    %433 = arith.addf %431, %432 : vector<2x32xf32>
    %434 = math.tanh %433 : vector<2x32xf32>
    %435 = arith.mulf %430, %434 : vector<2x32xf32>
    %c5_i32_176 = arith.constant 5 : i32
    %436 = arith.index_cast %c5_i32_176 : i32 to index
    %c0_177 = arith.constant 0 : index
    %c0_178 = arith.constant 0 : index
    %437 = vector.load %arg10[%436, %c0_177, %c0_178] : memref<8x2x128xf32, #tpu.memory_space<vmem>>, vector<1x2x128xf32>
    %438 = vector.shape_cast %437 : vector<1x2x128xf32> to vector<2x128xf32>
    %cst_179 = arith.constant dense<0.000000e+00> : vector<2x128xf32>
    %439 = tpu.matmul %435, %343, %cst_179 {dimension_numbers = #tpu.dot_dimension_numbers<[1], [0], [0], [1], [0, 0, 1, 1], [], []>} : vector<2x32xf32>, vector<32x128xf32>, vector<2x128xf32> -> vector<2x128xf32>
    %440 = arith.addf %438, %439 : vector<2x128xf32>
    %441 = arith.mulf %440, %8 : vector<2x128xf32>
    %442 = math.tanh %441 : vector<2x128xf32>
    %443 = arith.mulf %442, %8 : vector<2x128xf32>
    %444 = arith.addf %443, %11 : vector<2x128xf32>
    %445 = vector.extract_strided_slice %444 {offsets = [0, 0], sizes = [2, 32], strides = [1, 1]} : vector<2x128xf32> to vector<2x32xf32>
    %446 = vector.extract_strided_slice %444 {offsets = [0, 32], sizes = [2, 32], strides = [1, 1]} : vector<2x128xf32> to vector<2x32xf32>
    %447 = vector.extract_strided_slice %444 {offsets = [0, 64], sizes = [2, 32], strides = [1, 1]} : vector<2x128xf32> to vector<2x32xf32>
    %448 = vector.extract_strided_slice %444 {offsets = [0, 96], sizes = [2, 32], strides = [1, 1]} : vector<2x128xf32> to vector<2x32xf32>
    %449 = arith.mulf %446, %433 : vector<2x32xf32>
    %450 = arith.mulf %445, %447 : vector<2x32xf32>
    %451 = arith.addf %449, %450 : vector<2x32xf32>
    %452 = math.tanh %451 : vector<2x32xf32>
    %453 = arith.mulf %448, %452 : vector<2x32xf32>
    %c6_i32_180 = arith.constant 6 : i32
    %454 = arith.index_cast %c6_i32_180 : i32 to index
    %c0_181 = arith.constant 0 : index
    %c0_182 = arith.constant 0 : index
    %455 = vector.load %arg10[%454, %c0_181, %c0_182] : memref<8x2x128xf32, #tpu.memory_space<vmem>>, vector<1x2x128xf32>
    %456 = vector.shape_cast %455 : vector<1x2x128xf32> to vector<2x128xf32>
    %cst_183 = arith.constant dense<0.000000e+00> : vector<2x128xf32>
    %457 = tpu.matmul %453, %343, %cst_183 {dimension_numbers = #tpu.dot_dimension_numbers<[1], [0], [0], [1], [0, 0, 1, 1], [], []>} : vector<2x32xf32>, vector<32x128xf32>, vector<2x128xf32> -> vector<2x128xf32>
    %458 = arith.addf %456, %457 : vector<2x128xf32>
    %459 = arith.mulf %458, %8 : vector<2x128xf32>
    %460 = math.tanh %459 : vector<2x128xf32>
    %461 = arith.mulf %460, %8 : vector<2x128xf32>
    %462 = arith.addf %461, %11 : vector<2x128xf32>
    %463 = vector.extract_strided_slice %462 {offsets = [0, 0], sizes = [2, 32], strides = [1, 1]} : vector<2x128xf32> to vector<2x32xf32>
    %464 = vector.extract_strided_slice %462 {offsets = [0, 32], sizes = [2, 32], strides = [1, 1]} : vector<2x128xf32> to vector<2x32xf32>
    %465 = vector.extract_strided_slice %462 {offsets = [0, 64], sizes = [2, 32], strides = [1, 1]} : vector<2x128xf32> to vector<2x32xf32>
    %466 = vector.extract_strided_slice %462 {offsets = [0, 96], sizes = [2, 32], strides = [1, 1]} : vector<2x128xf32> to vector<2x32xf32>
    %467 = arith.mulf %464, %451 : vector<2x32xf32>
    %468 = arith.mulf %463, %465 : vector<2x32xf32>
    %469 = arith.addf %467, %468 : vector<2x32xf32>
    %470 = math.tanh %469 : vector<2x32xf32>
    %471 = arith.mulf %466, %470 : vector<2x32xf32>
    %c7_i32_184 = arith.constant 7 : i32
    %472 = arith.index_cast %c7_i32_184 : i32 to index
    %c0_185 = arith.constant 0 : index
    %c0_186 = arith.constant 0 : index
    %473 = vector.load %arg10[%472, %c0_185, %c0_186] : memref<8x2x128xf32, #tpu.memory_space<vmem>>, vector<1x2x128xf32>
    %474 = vector.shape_cast %473 : vector<1x2x128xf32> to vector<2x128xf32>
    %cst_187 = arith.constant dense<0.000000e+00> : vector<2x128xf32>
    %475 = tpu.matmul %471, %343, %cst_187 {dimension_numbers = #tpu.dot_dimension_numbers<[1], [0], [0], [1], [0, 0, 1, 1], [], []>} : vector<2x32xf32>, vector<32x128xf32>, vector<2x128xf32> -> vector<2x128xf32>
    %476 = arith.addf %474, %475 : vector<2x128xf32>
    %477 = arith.mulf %476, %8 : vector<2x128xf32>
    %478 = math.tanh %477 : vector<2x128xf32>
    %479 = arith.mulf %478, %8 : vector<2x128xf32>
    %480 = arith.addf %479, %11 : vector<2x128xf32>
    %481 = vector.extract_strided_slice %480 {offsets = [0, 0], sizes = [2, 32], strides = [1, 1]} : vector<2x128xf32> to vector<2x32xf32>
    %482 = vector.extract_strided_slice %480 {offsets = [0, 32], sizes = [2, 32], strides = [1, 1]} : vector<2x128xf32> to vector<2x32xf32>
    %483 = vector.extract_strided_slice %480 {offsets = [0, 64], sizes = [2, 32], strides = [1, 1]} : vector<2x128xf32> to vector<2x32xf32>
    %484 = vector.extract_strided_slice %480 {offsets = [0, 96], sizes = [2, 32], strides = [1, 1]} : vector<2x128xf32> to vector<2x32xf32>
    %485 = arith.mulf %482, %469 : vector<2x32xf32>
    %486 = arith.mulf %481, %483 : vector<2x32xf32>
    %487 = arith.addf %485, %486 : vector<2x32xf32>
    %488 = math.tanh %487 : vector<2x32xf32>
    %489 = arith.mulf %484, %488 : vector<2x32xf32>
    %c8_i32_188 = arith.constant 8 : i32
    %c0_189 = arith.constant 0 : index
    %c0_190 = arith.constant 0 : index
    %490 = vector.load %arg8[%c0_189, %c0_190] : memref<2x32xf32, #tpu.memory_space<vmem>>, vector<2x32xf32>
    tpu.vector_store %arg8[%c0_189, %c0_190], %489 {strides = array<i32>} : memref<2x32xf32, #tpu.memory_space<vmem>>, vector<2x32xf32>,
    return
  }
  func.func @transform_0(%arg0: i32) -> (i32, i32, i32) {
    %c0_i32 = arith.constant 0 : i32
    %c0_i32_0 = arith.constant 0 : i32
    %c0_i32_1 = arith.constant 0 : i32
    %c0_i32_2 = arith.constant 0 : i32
    return %c0_i32, %c0_i32_0, %c0_i32_1 : i32, i32, i32
  }
  func.func @transform_1(%arg0: i32) -> (i32, i32) {
    %c0_i32 = arith.constant 0 : i32
    %c0_i32_0 = arith.constant 0 : i32
    %c0_i32_1 = arith.constant 0 : i32
    return %c0_i32, %c0_i32_0 : i32, i32
  }
  func.func @transform_2(%arg0: i32) -> (i32, i32) {
    %c0_i32 = arith.constant 0 : i32
    %c0_i32_0 = arith.constant 0 : i32
    %c0_i32_1 = arith.constant 0 : i32
    return %c0_i32, %c0_i32_0 : i32, i32
  }
  func.func @transform_3(%arg0: i32) -> (i32, i32) {
    %c0_i32 = arith.constant 0 : i32
    %c0_i32_0 = arith.constant 0 : i32
    %c0_i32_1 = arith.constant 0 : i32
    return %c0_i32, %c0_i32_0 : i32, i32
  }
  func.func @transform_4(%arg0: i32) -> (i32, i32) {
    %c0_i32 = arith.constant 0 : i32
    %c0_i32_0 = arith.constant 0 : i32
    %c0_i32_1 = arith.constant 0 : i32
    return %c0_i32, %c0_i32_0 : i32, i32
  }
  func.func @transform_5(%arg0: i32) -> (i32, i32) {
    %c0_i32 = arith.constant 0 : i32
    %c0_i32_0 = arith.constant 0 : i32
    %c0_i32_1 = arith.constant 0 : i32
    return %c0_i32, %c0_i32_0 : i32, i32
  }
  func.func @transform_6(%arg0: i32) -> (i32, i32) {
    %c0_i32 = arith.constant 0 : i32
    %c0_i32_0 = arith.constant 0 : i32
    %c0_i32_1 = arith.constant 0 : i32
    return %c0_i32, %c0_i32_0 : i32, i32
  }
  func.func @transform_7(%arg0: i32) -> (i32, i32) {
    %c0_i32 = arith.constant 0 : i32
    %c0_i32_0 = arith.constant 0 : i32
    %c0_i32_1 = arith.constant 0 : i32
    return %c0_i32, %c0_i32_0 : i32, i32
  }
}

</mosaic_0001>

<bundles_post_ra>
// kernel: multivariate_rnn_forward.1
= control target key start
LH: loop header
LB: loop body
LE: loop exit
PB: predicated region body
PF: predicated region fallthrough
CT: control target
= control target key end

     0   :  { %12 = vsyncpa [#allocation5], 0  ;;  %s1976_s0 = inlined_call_operand.vmem [shape: f32[8,2,4], index: 0, kind: input, shape index: {}]   ;;  %s1977_s1 = inlined_call_operand.vmem [shape: f32[4,128], index: 1, kind: input, shape index: {}]   ;;  %s1978_s2 = inlined_call_operand.hbm [shape: f32[32,128], index: 2, kind: input, shape index: {}]   ;;  %s1979_s3 = inlined_call_operand.vmem [shape: f32[1,128], index: 3, kind: input, shape index: {}]   ;;  %s1980_s4 = inlined_call_operand.hbm [shape: f32[32,128], index: 4, kind: input, shape index: {}]   ;;  %s1981_s5 = inlined_call_operand.hbm [shape: f32[32,128], index: 5, kind: input, shape index: {}]   ;;  %s1982_s6 = inlined_call_operand.vmem [shape: f32[1,128], index: 6, kind: input, shape index: {}]   ;;  %s1983_s7 = inlined_call_operand.hbm [shape: f32[2,32], index: 7, kind: output, shape index: {}]  }
   0x1   :  { %13 = vsyncpa [#allocation8], 0 }
   0x2   :  { %14 = vsyncpa [#allocation6], 0  ;;  %s38_s26 = sshll.u32 %s1980_s4, 4  ;;  %s1556_s27 = smov [#allocation7]   ;;  %s39_s26 = int_to_ptr.hbm [resolvable:$true] %s38_s26 }
   0x3   :  { %s40_s28 = sshll.u32 %s1556_s27, 4  ;;  %s23_s8 = sshll.u32 %s1978_s2, 4  ;;  %s41_s28 = int_to_ptr.vmem [resolvable:$true] %s40_s28  ;;  %s24_s8 = int_to_ptr.hbm [resolvable:$true] %s23_s8 }
   0x4   :  { %s1557_s9 = smov 128   ;;  %s1558_s10 = smov 8  }
   0x5   :  { %46 = dma.hbm_to_vmem [thread:$0]  %s39_s26, 512, %s41_s28, [#allocation8], %s1557_s9, %s1557_s9, %s1558_s10  }
   0x6   :  { %s1559_s11 = smov [#allocation4]   ;;  %s51_s15 = sshll.u32 %s1981_s5, 4  ;;  %s52_s15 = int_to_ptr.hbm [resolvable:$true] %s51_s15 }
   0x7   :  { %s25_s12 = sshll.u32 %s1559_s11, 4  ;;  %s1560_s4 = smov [#allocation9]   ;;  %s26_s12 = int_to_ptr.vmem [resolvable:$true] %s25_s12 }
   0x8   :  { %31 = dma.hbm_to_vmem [thread:$0]  %s24_s8, 512, %s26_s12, [#allocation5], %s1557_s9, %s1557_s9, %s1558_s10  }
   0x9   :  { %s53_s16 = sshll.u32 %s1560_s4, 4  ;;  %s54_s16 = int_to_ptr.vmem [resolvable:$true] %s53_s16 }
   0xa   :  { %59 = dma.hbm_to_vmem [thread:$0]  %s52_s15, 512, %s54_s16, [#allocation8], %s1557_s9, %s1557_s9, %s1558_s10  }
   0xb   :  { %1550 = dma.done.wait [#allocation5], 512  }
   0xc   :  { %1551 = vsyncadd [#allocation5], 4294966784 }
   0xd   :  { %1552 = dma.done.wait [#allocation8], 1024  }
   0xe   :  { %1553 = vsyncadd [#allocation8], 4294966272  ;;  %vm91_vm0 = vcmask 1043456   ;;  %vm87_vm1 = vcmask 31744   ;;  %v81_v0 = vld [vmem:[%s1977_s1] sm:$0xf]  ;;  %v74_v11 = vlaneseq }
   0xf   :  { %v86_v1 = vld [vmem:[%s1976_s0] sm:$0x3]  ;;  %1333 = vmatpush.msk.msra.mxu0 %vm91_vm0, %v81_v0  ;;  %v1622_v2 = vld [vmem:[#allocation4 + $0x18] sm:$0xff]  ;;  %1336 = vmatpush.msk.msra.mxu1 %vm91_vm0, %v81_v0  ;;  %v1628_v3 = vld [vmem:[#allocation4 + $0x10] sm:$0xff]  ;;  %v1561_v7 = vmov 0.0   ;;  %v1562_v15 = vmov 0.5  }
  0x10   :  { %1334 = vmatmul.msk.f32.vlgmr.msra.gmra.mxu0 %vm87_vm1, %v86_v1  ;;  %1339 = vmatpush.msk.msra.mxu2 %vm91_vm0, %v81_v0  ;;  %v1633_v4 = vld [vmem:[#allocation4 + $0x8] sm:$0xff]  ;;  %v1642_v6 = vld [vmem:[#allocation4] sm:$0xff]  ;;  %v75_v12 = vand.u32 127, %v74_v11  ;;  %s1564_s22 = smov 32   ;;  %vm360_vm5 = vcmask 254976   ;;  %vm310_vm6 = vcmask 261120  }
  0x11   :  { %1348 = vmatpush.msk.msrb.mxu1 %vm91_vm0, %v81_v0  ;;  %1345 = vmatpush.msk.msrb.mxu0 %vm91_vm0, %v81_v0  ;;  %v1344_v5 = vld [vmem:[%s1976_s0 + $0x8] sm:$0x3]  ;;  %v1654_v8 = vld [vmem:[%s1979_s3] ss:$0 sm:$0xff]  ;;  %s1563_s3 = smov 64   ;;  %s1322_s4 = sshll.u32 %s1983_s7, 4  ;;  %s1323_s4 = int_to_ptr.hbm [resolvable:$true] %s1322_s4 }
  0x12   :  { %1351 = vmatpush.msk.msrb.mxu2 %vm91_vm0, %v81_v0  ;;  %1342 = vmatpush.msk.msra.mxu3 %vm91_vm0, %v81_v0  ;;  %vm76_vm2 = vcmp.ge.s32.totalorder %v75_v12, 64  ;;  %vm77_vm3 = vcmp.lt.s32.totalorder %v75_v12, 96  ;;  %v1335_v31 = vld [vmem:[%s1976_s0 + $0x2] sm:$0x3]  ;;  %v1347_v32 = vld [vmem:[%s1976_s0 + $0xa] sm:$0x3] }
  0x13   :  { %326 = vmatpush.msra.mxu0 %v1622_v2  ;;  %vm78_vm4 = vmand %vm76_vm2, %vm77_vm3  ;;  %1337 = vmatmul.msk.f32.vlgmr.msra.gmra.mxu1 %vm87_vm1, %v1335_v31  ;;  %v1338_v53 = vld [vmem:[%s1976_s0 + $0x4] sm:$0x3]  ;;  %v1350_v54 = vld [vmem:[%s1976_s0 + $0xc] sm:$0x3] }
  0x14   :  { %1354 = vmatpush.msk.msrb.mxu3 %vm91_vm0, %v81_v0  ;;  %v1658_v16 = vsel %vm78_vm4, 1.0, %v1562_v15  ;;  %v1661_v22 = vsel %vm78_vm4, 0.0, %v1562_v15  ;;  %377 = vmatpush.msra.mxu1 %v1622_v2 }
  0x15   :  { %327 = vmatpush.msra.mxu0 %v1628_v3  ;;  %1340 = vmatmul.msk.f32.vlgmr.msra.gmra.mxu2 %vm87_vm1, %v1338_v53 }
  0x16   :  { %378 = vmatpush.msra.mxu1 %v1628_v3  ;;  %428 = vmatpush.msra.mxu2 %v1622_v2 }
  0x17   :  { %328 = vmatpush.msra.mxu0 %v1633_v4 }
  0x18   :  { %1346 = vmatmul.msk.f32.vlgmr.msrb.gmra.mxu0 %vm87_vm1, %v1344_v5  ;;  %379 = vmatpush.msra.mxu1 %v1633_v4 }
  0x19   :  { %329 = vmatpush.msra.mxu0 %v1642_v6  ;;  %429 = vmatpush.msra.mxu2 %v1628_v3 }
  0x1a   :  { %380 = vmatpush.msra.mxu1 %v1642_v6 }
  0x1b   :  { %530 = vmatpush.msrb.mxu0 %v1622_v2  ;;  %1349 = vmatmul.msk.f32.vlgmr.msrb.gmra.mxu1 %vm87_vm1, %v1347_v32 }
  0x1c   :  { %581 = vmatpush.msrb.mxu1 %v1622_v2  ;;  %430 = vmatpush.msra.mxu2 %v1633_v4 }
  0x1d   :  { %531 = vmatpush.msrb.mxu0 %v1628_v3  ;;  %1352 = vmatmul.msk.f32.vlgmr.msrb.gmra.mxu2 %vm87_vm1, %v1350_v54 }
  0x1e   :  { %582 = vmatpush.msrb.mxu1 %v1628_v3  ;;  %431 = vmatpush.msra.mxu2 %v1642_v6 }
  0x1f   :  { %532 = vmatpush.msrb.mxu0 %v1633_v4 }
  0x20   :  { %330 = vmatmul.f32.vlgmr.msra.gmra.mxu0 %v1561_v7  ;;  %583 = vmatpush.msrb.mxu1 %v1633_v4 }
  0x21   :  { %533 = vmatpush.msrb.mxu0 %v1642_v6  ;;  %632 = vmatpush.msrb.mxu2 %v1622_v2 }
  0x22   :  { %584 = vmatpush.msrb.mxu1 %v1642_v6 }
  0x23   :  { %633 = vmatpush.msrb.mxu2 %v1628_v3 }
  0x25   :  { %634 = vmatpush.msrb.mxu2 %v1633_v4 }
  0x27   :  { %635 = vmatpush.msrb.mxu2 %v1642_v6 }
  0x8d   :  { %v112_v9 = vpop.f32.mrf.mxu0 }
  0x8e   :  { %v113_v10 = vadd.f32 %v1654_v8, %v112_v9 }
  0x90   :  { %115 = vst [vmem:[#allocation3] sm:$0x3] %v113_v10  ;;  %v138_v35 = vpop.f32.mrf.mxu1 }
  0x91   :  { %v139_v36 = vadd.f32 %v1654_v8, %v138_v35 }
  0x93   :  { %142 = vst [vmem:[#allocation3 + $0x2] sm:$0x3] %v139_v36 }
  0x95   :  { %v219_v13 = vpop.f32.mrf.mxu0 }
  0x96   :  { %v220_v14 = vadd.f32 %v1654_v8, %v219_v13 }
  0x97   :  { %v309_v17 = vld [vmem:[#allocation3] sm:$0x3] }
  0x98   :  { %223 = vst [vmem:[#allocation3 + $0x8] sm:$0x3] %v220_v14  ;;  %v246_v37 = vpop.f32.mrf.mxu1  ;;  %v165_v57 = vpop.f32.mrf.mxu2 }
  0x99   :  { %v247_v38 = vadd.f32 %v1654_v8, %v246_v37  ;;  %v166_v58 = vadd.f32 %v1654_v8, %v165_v57 }
  0x9a   :  { %v362_v40 = vld [vmem:[#allocation3 + $0x2] sm:$0x3] }
  0x9b   :  { %250 = vst [vmem:[#allocation3 + $0xa] sm:$0x3] %v247_v38  ;;  %v1750_v38 = vld [vmem:[#allocation7 + $0x18] sm:$0xff] }
  0x9c   :  { %169 = vst [vmem:[#allocation3 + $0x4] sm:$0x3] %v166_v58  ;;  %743 = vmatpush.msra.mxu0 %v1750_v38 }
  0x9d   :  { %v331_v18 = vpop.f32.mrf.mxu0 }
  0x9e   :  { %v334_v19 = vadd.f32 %v331_v18, %v309_v17  ;;  %v1341_v18 = vld [vmem:[%s1976_s0 + $0x6] sm:$0x3] }
  0x9f   :  { %1343 = vmatmul.msk.f32.vlgmr.msra.gmra.mxu3 %vm87_vm1, %v1341_v18 }
  0xa0   :  { %v335_v20 = vmul.f32 %v334_v19, %v1658_v16  ;;  %v273_v59 = vpop.f32.mrf.mxu2  ;;  %479 = vmatpush.msra.mxu3 %v1622_v2  ;;  %v1353_v19 = vld [vmem:[%s1976_s0 + $0xe] sm:$0x3] }
  0xa1   :  { %v274_v60 = vadd.f32 %v1654_v8, %v273_v59 }
  0xa2   :  { %1390 = vtanh.f32 %v335_v20  ;;  %480 = vmatpush.msra.mxu3 %v1628_v3 }
  0xa3   :  { %277 = vst [vmem:[#allocation3 + $0xc] sm:$0x3] %v274_v60  ;;  %v413_v62 = vld [vmem:[#allocation3 + $0x4] sm:$0x3] }
  0xa4   :  { %481 = vmatpush.msra.mxu3 %v1633_v4 }
  0xa6   :  { %482 = vmatpush.msra.mxu3 %v1642_v6 }
  0xa7   :  { %1355 = vmatmul.msk.f32.vlgmr.msrb.gmra.mxu3 %vm87_vm1, %v1353_v19 }
  0xa8   :  { %v1391_v21 = vpop.eup %1390  ;;  %683 = vmatpush.msrb.mxu3 %v1622_v2 }
  0xa9   :  { %v337_v23 = vmul.f32 %v1391_v21, %v1658_v16 }
  0xaa   :  { %684 = vmatpush.msrb.mxu3 %v1628_v3 }
  0xab   :  { %v338_v24 = vadd.f32 %v337_v23, %v1661_v22 }
  0xac   :  { %685 = vmatpush.msrb.mxu3 %v1633_v4 }
  0xad   :  { %341 = vrot.lane.b32.xlu0 %v338_v24, %s1563_s3  ;;  %v339_v27 = vmul.f32 0.0, %v338_v24 }
  0xae   :  { %686 = vmatpush.msrb.mxu3 %v1642_v6 }
 0x11f   :  { %v342_v25 = vpop.permute.xlu0 %341 }
 0x120   :  { %v344_v26 = vmul.f32 %v342_v25, %v338_v24 }
 0x122   :  { %346 = vrot.lane.b32.xlu0 %v344_v26, %s1564_s22 }
 0x194   :  { %v347_v28 = vpop.permute.xlu0 %346 }
 0x195   :  { %v349_v29 = vadd.f32 %v347_v28, %v339_v27 }
 0x197   :  { %1392 = vtanh.f32 %v349_v29 }
 0x19d   :  { %v1393_v30 = vpop.eup %1392 }
 0x19e   :  { %352 = vrot.lane.b32.xlu1 %v1393_v30, %s1563_s3 }
 0x210   :  { %v353_v33 = vpop.permute.xlu1 %352 }
 0x211   :  { %v355_v34 = vmul.f32 %v353_v33, %v338_v24  ;;  %v192_v24 = vpop.f32.mrf.mxu3 }
 0x212   :  { %v193_v25 = vadd.f32 %v1654_v8, %v192_v24 }
 0x213   :  { %357 = vrot.lane.b32.xlu1 %v355_v34, %s1564_s22 }
 0x214   :  { %196 = vst [vmem:[#allocation3 + $0x6] sm:$0x3] %v193_v25 }
 0x219   :  { %v300_v2 = vpop.f32.mrf.mxu3 }
 0x21a   :  { %v301_v3 = vadd.f32 %v1654_v8, %v300_v2 }
 0x21b   :  { %v464_v4 = vld [vmem:[#allocation3 + $0x6] sm:$0x3] }
 0x21c   :  { %304 = vst [vmem:[#allocation3 + $0xe] sm:$0x3] %v301_v3 }
 0x285   :  { %v358_v39 = vpop.permute.xlu1 %357 }
 0x286   :  { %361 = vst.msk [vmem:[#allocation2] sm:$0x3] %vm360_vm5, %v358_v39  ;;  %1356 = vmatmul.msk.f32.vlgmr.msra.gmra.mxu1 %vm310_vm6, %v358_v39  ;;  %v1752_v39 = vld [vmem:[#allocation7 + $0x10] sm:$0xff] }
 0x287   :  { %768 = vmatpush.msra.mxu1 %v1750_v38  ;;  %744 = vmatpush.msra.mxu0 %v1752_v39 }
 0x289   :  { %769 = vmatpush.msra.mxu1 %v1752_v39 }
 0x303   :  { %v382_v41 = vpop.f32.mrf.mxu1 }
 0x304   :  { %v385_v42 = vadd.f32 %v382_v41, %v362_v40  ;;  %v1756_v40 = vld [vmem:[#allocation7 + $0x8] sm:$0xff]  ;;  %v1762_v41 = vld [vmem:[#allocation7] sm:$0xff] }
 0x305   :  { %745 = vmatpush.msra.mxu0 %v1756_v40  ;;  %770 = vmatpush.msra.mxu1 %v1756_v40 }
 0x306   :  { %v386_v43 = vmul.f32 %v385_v42, %v1658_v16 }
 0x307   :  { %746 = vmatpush.msra.mxu0 %v1762_v41  ;;  %771 = vmatpush.msra.mxu1 %v1762_v41 }
 0x308   :  { %1394 = vtanh.f32 %v386_v43  ;;  %v727_v43 = vld [vmem:[#allocation2] sm:$0x3] }
 0x30e   :  { %v1395_v44 = vpop.eup %1394 }
 0x30f   :  { %v388_v45 = vmul.f32 %v1395_v44, %v1658_v16  ;;  %v515_v44 = vld [vmem:[#allocation3 + $0x8] sm:$0x3] }
 0x311   :  { %v389_v46 = vadd.f32 %v388_v45, %v1661_v22 }
 0x313   :  { %392 = vrot.lane.b32.xlu2 %v389_v46, %s1563_s3  ;;  %v390_v49 = vmul.f32 %v389_v46, %v349_v29 }
 0x36d   :  { %v393_v47 = vpop.permute.xlu2 %392 }
 0x36e   :  { %v395_v48 = vmul.f32 %v393_v47, %v389_v46 }
 0x370   :  { %397 = vrot.lane.b32.xlu2 %v395_v48, %s1564_s22  ;;  %v1785_v48 = vld [vmem:[%s1982_s6] ss:$0 sm:$0xff]  ;;  %s1565_s6 = smov [#allocation10]  }
 0x371   :  { %s1320_s13 = sshll.u32 %s1565_s6, 4  ;;  %s1321_s13 = int_to_ptr.vmem [resolvable:$true] %s1320_s13 }
 0x3ca   :  { %v398_v50 = vpop.permute.xlu2 %397 }
 0x3cb   :  { %v400_v51 = vadd.f32 %v398_v50, %v390_v49 }
 0x3cd   :  { %1396 = vtanh.f32 %v400_v51 }
 0x3d3   :  { %v1397_v52 = vpop.eup %1396 }
 0x3d4   :  { %403 = vrot.lane.b32.xlu0 %v1397_v52, %s1563_s3 }
 0x446   :  { %v404_v55 = vpop.permute.xlu0 %403 }
 0x447   :  { %v406_v56 = vmul.f32 %v404_v55, %v389_v46 }
 0x449   :  { %408 = vrot.lane.b32.xlu1 %v406_v56, %s1564_s22 }
 0x4bb   :  { %v409_v61 = vpop.permute.xlu1 %408 }
 0x4bc   :  { %412 = vst.msk [vmem:[#allocation2 + $0x2] sm:$0x3] %vm360_vm5, %v409_v61  ;;  %1357 = vmatmul.msk.f32.vlgmr.msra.gmra.mxu2 %vm310_vm6, %v409_v61 }
 0x4bd   :  { %793 = vmatpush.msra.mxu2 %v1750_v38 }
 0x4bf   :  { %794 = vmatpush.msra.mxu2 %v1752_v39 }
 0x4c1   :  { %795 = vmatpush.msra.mxu2 %v1756_v40 }
 0x4c3   :  { %796 = vmatpush.msra.mxu2 %v1762_v41 }
 0x53f   :  { %v433_v63 = vpop.f32.mrf.mxu2 }
 0x540   :  { %v436_v0 = vadd.f32 %v433_v63, %v413_v62  ;;  %v1797_v62 = vld [vmem:[#allocation9 + $0x18] sm:$0xff]  ;;  %v1799_v63 = vld [vmem:[#allocation9 + $0x10] sm:$0xff] }
 0x542   :  { %v437_v1 = vmul.f32 %v436_v0, %v1658_v16  ;;  %v1802_v0 = vld [vmem:[#allocation9 + $0x8] sm:$0xff] }
 0x544   :  { %1398 = vtanh.f32 %v437_v1  ;;  %v1805_v1 = vld [vmem:[#allocation9] sm:$0xff] }
 0x54a   :  { %v1399_v5 = vpop.eup %1398 }
 0x54b   :  { %v439_v9 = vmul.f32 %v1399_v5, %v1658_v16 }
 0x54d   :  { %v440_v10 = vadd.f32 %v439_v9, %v1661_v22  ;;  %v752_v9 = vld [vmem:[#allocation2 + $0x2] sm:$0x3] }
 0x54f   :  { %443 = vrot.lane.b32.xlu2 %v440_v10, %s1563_s3  ;;  %v441_v13 = vmul.f32 %v440_v10, %v400_v51 }
 0x5a9   :  { %v444_v11 = vpop.permute.xlu2 %443 }
 0x5aa   :  { %v446_v12 = vmul.f32 %v444_v11, %v440_v10  ;;  %v566_v11 = vld [vmem:[#allocation3 + $0xa] sm:$0x3] }
 0x5ac   :  { %448 = vrot.lane.b32.xlu0 %v446_v12, %s1564_s22 }
 0x61e   :  { %v449_v14 = vpop.permute.xlu0 %448 }
 0x61f   :  { %v451_v15 = vadd.f32 %v449_v14, %v441_v13 }
 0x621   :  { %1400 = vtanh.f32 %v451_v15 }
 0x627   :  { %v1401_v17 = vpop.eup %1400 }
 0x628   :  { %454 = vrot.lane.b32.xlu1 %v1401_v17, %s1563_s3 }
 0x69a   :  { %v455_v20 = vpop.permute.xlu1 %454 }
 0x69b   :  { %v457_v21 = vmul.f32 %v455_v20, %v440_v10 }
 0x69d   :  { %459 = vrot.lane.b32.xlu2 %v457_v21, %s1564_s22 }
 0x6f7   :  { %v460_v23 = vpop.permute.xlu2 %459 }
 0x6f8   :  { %463 = vst.msk [vmem:[#allocation2 + $0x4] sm:$0x3] %vm360_vm5, %v460_v23  ;;  %1358 = vmatmul.msk.f32.vlgmr.msra.gmra.mxu3 %vm310_vm6, %v460_v23 }
 0x6f9   :  { %818 = vmatpush.msra.mxu3 %v1750_v38 }
 0x6fb   :  { %819 = vmatpush.msra.mxu3 %v1752_v39 }
 0x6fd   :  { %820 = vmatpush.msra.mxu3 %v1756_v40 }
 0x6ff   :  { %821 = vmatpush.msra.mxu3 %v1762_v41 }
 0x77b   :  { %v484_v26 = vpop.f32.mrf.mxu3 }
 0x77c   :  { %v487_v6 = vadd.f32 %v484_v26, %v464_v4 }
 0x77e   :  { %v488_v27 = vmul.f32 %v487_v6, %v1658_v16 }
 0x780   :  { %1402 = vtanh.f32 %v488_v27 }
 0x786   :  { %v1403_v28 = vpop.eup %1402 }
 0x787   :  { %v490_v29 = vmul.f32 %v1403_v28, %v1658_v16 }
 0x789   :  { %v491_v30 = vadd.f32 %v490_v29, %v1661_v22 }
 0x78b   :  { %494 = vrot.lane.b32.xlu0 %v491_v30, %s1563_s3  ;;  %v492_v33 = vmul.f32 %v491_v30, %v451_v15 }
 0x7fd   :  { %v495_v31 = vpop.permute.xlu0 %494 }
 0x7fe   :  { %v497_v32 = vmul.f32 %v495_v31, %v491_v30 }
 0x800   :  { %499 = vrot.lane.b32.xlu1 %v497_v32, %s1564_s22 }
 0x872   :  { %v500_v8 = vpop.permute.xlu1 %499 }
 0x873   :  { %v502_v34 = vadd.f32 %v500_v8, %v492_v33 }
 0x875   :  { %1404 = vtanh.f32 %v502_v34 }
 0x87b   :  { %v1405_v35 = vpop.eup %1404 }
 0x87c   :  { %505 = vrot.lane.b32.xlu2 %v1405_v35, %s1563_s3 }
 0x8d6   :  { %v506_v36 = vpop.permute.xlu2 %505 }
 0x8d7   :  { %v508_v37 = vmul.f32 %v506_v36, %v491_v30 }
 0x8d9   :  { %510 = vrot.lane.b32.xlu0 %v508_v37, %s1564_s22 }
 0x94b   :  { %v511_v42 = vpop.permute.xlu0 %510 }
 0x94c   :  { %514 = vst.msk [vmem:[#allocation2 + $0x6] sm:$0x3] %vm360_vm5, %v511_v42  ;;  %1359 = vmatmul.msk.f32.vlgmr.msrb.gmra.mxu0 %vm310_vm6, %v511_v42 }
 0x94d   :  { %843 = vmatpush.msrb.mxu0 %v1750_v38 }
 0x94f   :  { %844 = vmatpush.msrb.mxu0 %v1752_v39 }
 0x951   :  { %845 = vmatpush.msrb.mxu0 %v1756_v40 }
 0x953   :  { %846 = vmatpush.msrb.mxu0 %v1762_v41 }
 0x954   :  { %1363 = vmatmul.msk.f32.vlgmr.msra.gmra.mxu0 %vm310_vm6, %v727_v43 }
 0x955   :  { %944 = vmatpush.msra.mxu0 %v1797_v62 }
 0x957   :  { %945 = vmatpush.msra.mxu0 %v1799_v63 }
 0x959   :  { %946 = vmatpush.msra.mxu0 %v1802_v0 }
 0x95b   :  { %947 = vmatpush.msra.mxu0 %v1805_v1 }
 0x9c9   :  { %v535_v45 = vpop.f32.mrf.mxu0 }
 0x9ca   :  { %v538_v46 = vadd.f32 %v535_v45, %v515_v44 }
 0x9cc   :  { %v539_v47 = vmul.f32 %v538_v46, %v1658_v16  ;;  %v777_v46 = vld [vmem:[#allocation2 + $0x4] sm:$0x3] }
 0x9ce   :  { %1406 = vtanh.f32 %v539_v47 }
 0x9d1   :  { %v748_v49 = vpop.f32.mrf.mxu0 }
 0x9d2   :  { %v749_v50 = vadd.f32 %v1785_v48, %v748_v49 }
 0x9d4   :  { %v1407_v51 = vpop.eup %1406  ;;  %751 = vst [vmem:[#allocation3] sm:$0x3] %v749_v50  ;;  %v617_v50 = vld [vmem:[#allocation3 + $0xc] sm:$0x3] }
 0x9d5   :  { %v541_v52 = vmul.f32 %v1407_v51, %v1658_v16 }
 0x9d7   :  { %v542_v53 = vadd.f32 %v541_v52, %v1661_v22 }
 0x9d9   :  { %545 = vrot.lane.b32.xlu1 %v542_v53, %s1563_s3  ;;  %v543_v56 = vmul.f32 %v542_v53, %v502_v34 }
 0xa4b   :  { %v546_v54 = vpop.permute.xlu1 %545 }
 0xa4c   :  { %v548_v55 = vmul.f32 %v546_v54, %v542_v53 }
 0xa4e   :  { %550 = vrot.lane.b32.xlu2 %v548_v55, %s1564_s22 }
 0xaa8   :  { %v551_v57 = vpop.permute.xlu2 %550 }
 0xaa9   :  { %v1792_v58 = vadd.f32 %v551_v57, %v543_v56 }
 0xaab   :  { %1408 = vtanh.f32 %v1792_v58 }
 0xab1   :  { %v1409_v59 = vpop.eup %1408 }
 0xab2   :  { %556 = vrot.lane.b32.xlu0 %v1409_v59, %s1563_s3 }
 0xb24   :  { %v557_v60 = vpop.permute.xlu0 %556 }
 0xb25   :  { %v559_v61 = vmul.f32 %v557_v60, %v542_v53 }
 0xb27   :  { %561 = vrot.lane.b32.xlu1 %v559_v61, %s1564_s22 }
 0xb99   :  { %v562_v5 = vpop.permute.xlu1 %561 }
 0xb9a   :  { %565 = vst.msk [vmem:[#allocation2 + $0x8] sm:$0x3] %vm360_vm5, %v562_v5  ;;  %1360 = vmatmul.msk.f32.vlgmr.msrb.gmra.mxu1 %vm310_vm6, %v562_v5 }
 0xb9b   :  { %868 = vmatpush.msrb.mxu1 %v1750_v38 }
 0xb9d   :  { %869 = vmatpush.msrb.mxu1 %v1752_v39 }
 0xb9f   :  { %870 = vmatpush.msrb.mxu1 %v1756_v40 }
 0xba1   :  { %v827_v10 = vld [vmem:[#allocation2 + $0x8] sm:$0x3]  ;;  %871 = vmatpush.msrb.mxu1 %v1762_v41 }
 0xba2   :  { %1364 = vmatmul.msk.f32.vlgmr.msra.gmra.mxu1 %vm310_vm6, %v752_v9  ;;  %1367 = vmatmul.msk.f32.vlgmr.msrb.gmra.mxu0 %vm310_vm6, %v827_v10 }
 0xba3   :  { %992 = vmatpush.msra.mxu1 %v1797_v62  ;;  %1136 = vmatpush.msrb.mxu0 %v1797_v62 }
 0xba5   :  { %993 = vmatpush.msra.mxu1 %v1799_v63  ;;  %1137 = vmatpush.msrb.mxu0 %v1799_v63 }
 0xba7   :  { %994 = vmatpush.msra.mxu1 %v1802_v0  ;;  %1138 = vmatpush.msrb.mxu0 %v1802_v0 }
 0xba9   :  { %995 = vmatpush.msra.mxu1 %v1805_v1  ;;  %1139 = vmatpush.msrb.mxu0 %v1805_v1 }
 0xbaa   :  { %948 = vmatmul.f32.vlgmr.msra.gmra.mxu0 %v1561_v7  ;;  %v931_v7 = vld [vmem:[#allocation3] sm:$0x3] }
 0xc17   :  { %v586_v12 = vpop.f32.mrf.mxu1 }
 0xc18   :  { %v589_v13 = vadd.f32 %v586_v12, %v566_v11 }
 0xc1a   :  { %v590_v14 = vmul.f32 %v589_v13, %v1658_v16 }
 0xc1c   :  { %1410 = vtanh.f32 %v590_v14 }
 0xc1f   :  { %v773_v15 = vpop.f32.mrf.mxu1  ;;  %v848_v17 = vpop.f32.mrf.mxu0 }
 0xc20   :  { %v774_v18 = vadd.f32 %v1785_v48, %v773_v15  ;;  %v849_v19 = vadd.f32 %v1785_v48, %v848_v17 }
 0xc22   :  { %v1411_v20 = vpop.eup %1410  ;;  %776 = vst [vmem:[#allocation3 + $0x2] sm:$0x3] %v774_v18 }
 0xc23   :  { %851 = vst [vmem:[#allocation3 + $0x8] sm:$0x3] %v849_v19  ;;  %v592_v21 = vmul.f32 %v1411_v20, %v1658_v16 }
 0xc25   :  { %v593_v23 = vadd.f32 %v592_v21, %v1661_v22 }
 0xc27   :  { %596 = vrot.lane.b32.xlu2 %v593_v23, %s1563_s3  ;;  %v949_v24 = vpop.f32.mrf.mxu0  ;;  %v594_v30 = vmul.f32 %v593_v23, %v1792_v58 }
 0xc28   :  { %v952_v25 = vadd.f32 %v949_v24, %v931_v7 }
 0xc29   :  { %v974_v61 = vld [vmem:[#allocation3 + $0x2] sm:$0x3] }
 0xc2a   :  { %v953_v2 = vmul.f32 %v952_v25, %v1658_v16 }
 0xc2c   :  { %1412 = vtanh.f32 %v953_v2 }
 0xc32   :  { %v1413_v3 = vpop.eup %1412 }
 0xc33   :  { %v955_v4 = vmul.f32 %v1413_v3, %v1658_v16 }
 0xc35   :  { %v956_v26 = vadd.f32 %v955_v4, %v1661_v22 }
 0xc37   :  { %959 = vrot.lane.b32.xlu0 %v956_v26, %s1563_s3  ;;  %v957_v8 = vmul.f32 0.0, %v956_v26 }
 0xc81   :  { %v597_v6 = vpop.permute.xlu2 %596 }
 0xc82   :  { %v599_v27 = vmul.f32 %v597_v6, %v593_v23 }
 0xc84   :  { %601 = vrot.lane.b32.xlu1 %v599_v27, %s1564_s22 }
 0xca9   :  { %v960_v28 = vpop.permute.xlu0 %959 }
 0xcaa   :  { %v962_v29 = vmul.f32 %v960_v28, %v956_v26  ;;  %v802_v28 = vld [vmem:[#allocation2 + $0x6] sm:$0x3] }
 0xcac   :  { %964 = vrot.lane.b32.xlu2 %v962_v29, %s1564_s22 }
 0xcf6   :  { %v602_v31 = vpop.permute.xlu1 %601 }
 0xcf7   :  { %v1839_v32 = vadd.f32 %v602_v31, %v594_v30 }
 0xcf9   :  { %1414 = vtanh.f32 %v1839_v32 }
 0xcff   :  { %v1415_v33 = vpop.eup %1414 }
 0xd00   :  { %607 = vrot.lane.b32.xlu0 %v1415_v33, %s1563_s3 }
 0xd06   :  { %v965_v34 = vpop.permute.xlu2 %964 }
 0xd07   :  { %v1843_v35 = vadd.f32 %v965_v34, %v957_v8 }
 0xd09   :  { %1416 = vtanh.f32 %v1843_v35 }
 0xd0f   :  { %v1417_v36 = vpop.eup %1416 }
 0xd10   :  { %970 = vrot.lane.b32.xlu1 %v1417_v36, %s1563_s3 }
 0xd72   :  { %v608_v37 = vpop.permute.xlu0 %607 }
 0xd73   :  { %v610_v42 = vmul.f32 %v608_v37, %v593_v23 }
 0xd75   :  { %612 = vrot.lane.b32.xlu2 %v610_v42, %s1564_s22 }
 0xd82   :  { %v971_v43 = vpop.permute.xlu1 %970 }
 0xd83   :  { %v973_v44 = vmul.f32 %v971_v43, %v956_v26 }
 0xd85   :  { %976 = vrot.lane.b32.xlu0 %v973_v44, %s1564_s22 }
 0xdcf   :  { %v613_v45 = vpop.permute.xlu2 %612 }
 0xdd0   :  { %616 = vst.msk [vmem:[#allocation2 + $0xa] sm:$0x3] %vm360_vm5, %v613_v45  ;;  %1361 = vmatmul.msk.f32.vlgmr.msrb.gmra.mxu2 %vm310_vm6, %v613_v45 }
 0xdd1   :  { %893 = vmatpush.msrb.mxu2 %v1750_v38 }
 0xdd3   :  { %894 = vmatpush.msrb.mxu2 %v1752_v39 }
 0xdd5   :  { %895 = vmatpush.msrb.mxu2 %v1756_v40 }
 0xdd7   :  { %v852_v47 = vld [vmem:[#allocation2 + $0xa] sm:$0x3]  ;;  %896 = vmatpush.msrb.mxu2 %v1762_v41 }
 0xdd8   :  { %1365 = vmatmul.msk.f32.vlgmr.msra.gmra.mxu2 %vm310_vm6, %v777_v46  ;;  %1368 = vmatmul.msk.f32.vlgmr.msrb.gmra.mxu1 %vm310_vm6, %v852_v47 }
 0xdd9   :  { %1040 = vmatpush.msra.mxu2 %v1797_v62  ;;  %1184 = vmatpush.msrb.mxu1 %v1797_v62 }
 0xddb   :  { %1041 = vmatpush.msra.mxu2 %v1799_v63  ;;  %1185 = vmatpush.msrb.mxu1 %v1799_v63 }
 0xddd   :  { %1042 = vmatpush.msra.mxu2 %v1802_v0  ;;  %1186 = vmatpush.msrb.mxu1 %v1802_v0 }
 0xddf   :  { %1043 = vmatpush.msra.mxu2 %v1805_v1  ;;  %1187 = vmatpush.msrb.mxu1 %v1805_v1 }
 0xdf7   :  { %v977_v49 = vpop.permute.xlu0 %976 }
 0xdf8   :  { %1371 = vmatmul.msk.f32.vlgmr.msra.gmra.mxu1 %vm310_vm6, %v977_v49 }
 0xe53   :  { %v637_v51 = vpop.f32.mrf.mxu2 }
 0xe54   :  { %v640_v52 = vadd.f32 %v637_v51, %v617_v50 }
 0xe55   :  { %v873_v53 = vpop.f32.mrf.mxu1 }
 0xe56   :  { %v641_v54 = vmul.f32 %v640_v52, %v1658_v16  ;;  %v874_v55 = vadd.f32 %v1785_v48, %v873_v53 }
 0xe58   :  { %1418 = vtanh.f32 %v641_v54  ;;  %876 = vst [vmem:[#allocation3 + $0xa] sm:$0x3] %v874_v55 }
 0xe5b   :  { %v798_v56 = vpop.f32.mrf.mxu2 }
 0xe5c   :  { %v799_v57 = vadd.f32 %v1785_v48, %v798_v56 }
 0xe5e   :  { %v1419_v58 = vpop.eup %1418  ;;  %801 = vst [vmem:[#allocation3 + $0x4] sm:$0x3] %v799_v57 }
 0xe5f   :  { %v643_v59 = vmul.f32 %v1419_v58, %v1658_v16 }
 0xe61   :  { %v644_v60 = vadd.f32 %v643_v59, %v1661_v22 }
 0xe63   :  { %647 = vrot.lane.b32.xlu1 %v644_v60, %s1563_s3  ;;  %v645_v19 = vmul.f32 %v644_v60, %v1839_v32 }
 0xe65   :  { %v1022_v37 = vld [vmem:[#allocation3 + $0x4] sm:$0x3] }
 0xe75   :  { %v997_v5 = vpop.f32.mrf.mxu1 }
 0xe76   :  { %v1000_v9 = vadd.f32 %v997_v5, %v974_v61 }
 0xe78   :  { %v1001_v10 = vmul.f32 %v1000_v9, %v1658_v16 }
 0xe7a   :  { %1420 = vtanh.f32 %v1001_v10 }
 0xe80   :  { %v1421_v11 = vpop.eup %1420 }
 0xe81   :  { %v1003_v12 = vmul.f32 %v1421_v11, %v1658_v16 }
 0xe83   :  { %v1004_v13 = vadd.f32 %v1003_v12, %v1661_v22 }
 0xe85   :  { %1007 = vrot.lane.b32.xlu2 %v1004_v13, %s1563_s3  ;;  %v1005_v7 = vmul.f32 %v1004_v13, %v1843_v35 }
 0xed5   :  { %v648_v14 = vpop.permute.xlu1 %647 }
 0xed6   :  { %v650_v15 = vmul.f32 %v648_v14, %v644_v60 }
 0xed8   :  { %652 = vrot.lane.b32.xlu0 %v650_v15, %s1564_s22 }
 0xedf   :  { %v1008_v17 = vpop.permute.xlu2 %1007 }
 0xee0   :  { %v1010_v18 = vmul.f32 %v1008_v17, %v1004_v13 }
 0xee2   :  { %1012 = vrot.lane.b32.xlu1 %v1010_v18, %s1564_s22 }
 0xf4a   :  { %v653_v20 = vpop.permute.xlu0 %652 }
 0xf4b   :  { %v1879_v21 = vadd.f32 %v653_v20, %v645_v19 }
 0xf4d   :  { %1422 = vtanh.f32 %v1879_v21 }
 0xf53   :  { %v1423_v23 = vpop.eup %1422 }
 0xf54   :  { %658 = vrot.lane.b32.xlu2 %v1423_v23, %s1563_s3  ;;  %v1013_v24 = vpop.permute.xlu1 %1012 }
 0xf55   :  { %v1884_v25 = vadd.f32 %v1013_v24, %v1005_v7 }
 0xf57   :  { %1424 = vtanh.f32 %v1884_v25 }
 0xf5d   :  { %v1425_v2 = vpop.eup %1424 }
 0xf5e   :  { %1018 = vrot.lane.b32.xlu0 %v1425_v2, %s1563_s3 }
 0xfae   :  { %v659_v3 = vpop.permute.xlu2 %658 }
 0xfaf   :  { %v661_v4 = vmul.f32 %v659_v3, %v644_v60 }
 0xfb1   :  { %663 = vrot.lane.b32.xlu1 %v661_v4, %s1564_s22  ;;  %v1118_v4 = vld [vmem:[#allocation3 + $0x8] sm:$0x3] }
 0xfd0   :  { %v1019_v26 = vpop.permute.xlu0 %1018 }
 0xfd1   :  { %v1021_v6 = vmul.f32 %v1019_v26, %v1004_v13 }
 0xfd3   :  { %1024 = vrot.lane.b32.xlu2 %v1021_v6, %s1564_s22 }
0x1023   :  { %v664_v27 = vpop.permute.xlu1 %663 }
0x1024   :  { %667 = vst.msk [vmem:[#allocation2 + $0xc] sm:$0x3] %vm360_vm5, %v664_v27  ;;  %1362 = vmatmul.msk.f32.vlgmr.msrb.gmra.mxu3 %vm310_vm6, %v664_v27 }
0x1025   :  { %918 = vmatpush.msrb.mxu3 %v1750_v38 }
0x1027   :  { %919 = vmatpush.msrb.mxu3 %v1752_v39  ;;  %v668_v39 = vld [vmem:[#allocation3 + $0xe] sm:$0x3] }
0x1029   :  { %920 = vmatpush.msrb.mxu3 %v1756_v40 }
0x102b   :  { %v877_v29 = vld [vmem:[#allocation2 + $0xc] sm:$0x3]  ;;  %921 = vmatpush.msrb.mxu3 %v1762_v41 }
0x102c   :  { %1366 = vmatmul.msk.f32.vlgmr.msra.gmra.mxu3 %vm310_vm6, %v802_v28  ;;  %1369 = vmatmul.msk.f32.vlgmr.msrb.gmra.mxu2 %vm310_vm6, %v877_v29 }
0x102d   :  { %1088 = vmatpush.msra.mxu3 %v1797_v62  ;;  %1232 = vmatpush.msrb.mxu2 %v1797_v62  ;;  %v1025_v38 = vpop.permute.xlu2 %1024 }
0x102f   :  { %1089 = vmatpush.msra.mxu3 %v1799_v63  ;;  %1233 = vmatpush.msrb.mxu2 %v1799_v63 }
0x1031   :  { %1090 = vmatpush.msra.mxu3 %v1802_v0  ;;  %1234 = vmatpush.msrb.mxu2 %v1802_v0 }
0x1033   :  { %1091 = vmatpush.msra.mxu3 %v1805_v1  ;;  %1235 = vmatpush.msrb.mxu2 %v1805_v1 }
0x1034   :  { %1372 = vmatmul.msk.f32.vlgmr.msra.gmra.mxu2 %vm310_vm6, %v1025_v38 }
0x10a7   :  { %v688_v40 = vpop.f32.mrf.mxu3 }
0x10a8   :  { %v691_v41 = vadd.f32 %v688_v40, %v668_v39 }
0x10aa   :  { %v692_v30 = vmul.f32 %v691_v41, %v1658_v16 }
0x10ac   :  { %1426 = vtanh.f32 %v692_v30 }
0x10af   :  { %v823_v31 = vpop.f32.mrf.mxu3  ;;  %v898_v32 = vpop.f32.mrf.mxu2 }
0x10b0   :  { %v824_v33 = vadd.f32 %v1785_v48, %v823_v31  ;;  %v899_v8 = vadd.f32 %v1785_v48, %v898_v32 }
0x10b2   :  { %v1427_v34 = vpop.eup %1426  ;;  %826 = vst [vmem:[#allocation3 + $0x6] sm:$0x3] %v824_v33 }
0x10b3   :  { %901 = vst [vmem:[#allocation3 + $0xc] sm:$0x3] %v899_v8  ;;  %v694_v35 = vmul.f32 %v1427_v34, %v1658_v16 }
0x10b5   :  { %v695_v36 = vadd.f32 %v694_v35, %v1661_v22  ;;  %v1166_v35 = vld [vmem:[#allocation3 + $0xa] sm:$0x3] }
0x10b7   :  { %698 = vrot.lane.b32.xlu0 %v695_v36, %s1563_s3  ;;  %v1045_v42 = vpop.f32.mrf.mxu2  ;;  %v696_v53 = vmul.f32 %v695_v36, %v1879_v21 }
0x10b8   :  { %v1048_v43 = vadd.f32 %v1045_v42, %v1022_v37 }
0x10b9   :  { %v1070_v17 = vld [vmem:[#allocation3 + $0x6] sm:$0x3] }
0x10ba   :  { %v1049_v44 = vmul.f32 %v1048_v43, %v1658_v16 }
0x10bc   :  { %1428 = vtanh.f32 %v1049_v44 }
0x10c2   :  { %v1429_v45 = vpop.eup %1428 }
0x10c3   :  { %v1051_v46 = vmul.f32 %v1429_v45, %v1658_v16 }
0x10c5   :  { %v1052_v47 = vadd.f32 %v1051_v46, %v1661_v22 }
0x10c7   :  { %1055 = vrot.lane.b32.xlu1 %v1052_v47, %s1563_s3  ;;  %v1053_v57 = vmul.f32 %v1052_v47, %v1884_v25 }
0x1129   :  { %v699_v49 = vpop.permute.xlu0 %698 }
0x112a   :  { %v701_v50 = vmul.f32 %v699_v49, %v695_v36 }
0x112c   :  { %703 = vrot.lane.b32.xlu2 %v701_v50, %s1564_s22 }
0x1139   :  { %v1056_v51 = vpop.permute.xlu1 %1055 }
0x113a   :  { %v1058_v52 = vmul.f32 %v1056_v51, %v1052_v47 }
0x113c   :  { %1060 = vrot.lane.b32.xlu0 %v1058_v52, %s1564_s22 }
0x1186   :  { %v704_v54 = vpop.permute.xlu2 %703 }
0x1187   :  { %v706_v55 = vadd.f32 %v704_v54, %v696_v53 }
0x1189   :  { %1430 = vtanh.f32 %v706_v55 }
0x118f   :  { %v1431_v56 = vpop.eup %1430 }
0x1190   :  { %709 = vrot.lane.b32.xlu1 %v1431_v56, %s1563_s3  ;;  %v1214_v56 = vld [vmem:[#allocation3 + $0xc] sm:$0x3] }
0x11ae   :  { %v1061_v58 = vpop.permute.xlu0 %1060 }
0x11af   :  { %v1063_v59 = vadd.f32 %v1061_v58, %v1053_v57 }
0x11b1   :  { %1432 = vtanh.f32 %v1063_v59 }
0x11b7   :  { %v1433_v60 = vpop.eup %1432 }
0x11b8   :  { %1066 = vrot.lane.b32.xlu2 %v1433_v60, %s1563_s3 }
0x1202   :  { %v710_v61 = vpop.permute.xlu1 %709 }
0x1203   :  { %v712_v5 = vmul.f32 %v710_v61, %v695_v36 }
0x1205   :  { %714 = vrot.lane.b32.xlu0 %v712_v5, %s1564_s22 }
0x1212   :  { %v1067_v9 = vpop.permute.xlu2 %1066 }
0x1213   :  { %v1069_v10 = vmul.f32 %v1067_v9, %v1052_v47 }
0x1215   :  { %1072 = vrot.lane.b32.xlu1 %v1069_v10, %s1564_s22 }
0x1277   :  { %v715_v11 = vpop.permute.xlu0 %714 }
0x1278   :  { %718 = vst.msk [vmem:[#allocation2 + $0xe] sm:$0x3] %vm360_vm5, %v715_v11 }
0x127f   :  { %v902_v12 = vld [vmem:[#allocation2 + $0xe] sm:$0x3] }
0x1280   :  { %1370 = vmatmul.msk.f32.vlgmr.msrb.gmra.mxu3 %vm310_vm6, %v902_v12 }
0x1281   :  { %1280 = vmatpush.msrb.mxu3 %v1797_v62 }
0x1283   :  { %1281 = vmatpush.msrb.mxu3 %v1799_v63 }
0x1285   :  { %1282 = vmatpush.msrb.mxu3 %v1802_v0 }
0x1287   :  { %v1073_v13 = vpop.permute.xlu1 %1072  ;;  %1283 = vmatpush.msrb.mxu3 %v1805_v1 }
0x1288   :  { %1373 = vmatmul.msk.f32.vlgmr.msra.gmra.mxu3 %vm310_vm6, %v1073_v13 }
0x1303   :  { %v923_v14 = vpop.f32.mrf.mxu3 }
0x1304   :  { %v924_v15 = vadd.f32 %v1785_v48, %v923_v14 }
0x1306   :  { %926 = vst [vmem:[#allocation3 + $0xe] sm:$0x3] %v924_v15 }
0x130b   :  { %v1093_v18 = vpop.f32.mrf.mxu3 }
0x130c   :  { %v1096_v19 = vadd.f32 %v1093_v18, %v1070_v17 }
0x130e   :  { %v1097_v20 = vmul.f32 %v1096_v19, %v1658_v16  ;;  %v1262_v19 = vld [vmem:[#allocation3 + $0xe] sm:$0x3] }
0x1310   :  { %1434 = vtanh.f32 %v1097_v20 }
0x1316   :  { %v1435_v62 = vpop.eup %1434 }
0x1317   :  { %v1099_v63 = vmul.f32 %v1435_v62, %v1658_v16 }
0x1319   :  { %v1100_v0 = vadd.f32 %v1099_v63, %v1661_v22 }
0x131b   :  { %1103 = vrot.lane.b32.xlu2 %v1100_v0, %s1563_s3  ;;  %v1101_v23 = vmul.f32 %v1100_v0, %v1063_v59 }
0x1375   :  { %v1104_v1 = vpop.permute.xlu2 %1103 }
0x1376   :  { %v1106_v21 = vmul.f32 %v1104_v1, %v1100_v0 }
0x1378   :  { %1108 = vrot.lane.b32.xlu0 %v1106_v21, %s1564_s22 }
0x13ea   :  { %v1109_v48 = vpop.permute.xlu0 %1108 }
0x13eb   :  { %v1111_v7 = vadd.f32 %v1109_v48, %v1101_v23 }
0x13ed   :  { %1436 = vtanh.f32 %v1111_v7 }
0x13f3   :  { %v1437_v24 = vpop.eup %1436 }
0x13f4   :  { %1114 = vrot.lane.b32.xlu1 %v1437_v24, %s1563_s3 }
0x1466   :  { %v1115_v25 = vpop.permute.xlu1 %1114 }
0x1467   :  { %v1117_v2 = vmul.f32 %v1115_v25, %v1100_v0 }
0x1469   :  { %1120 = vrot.lane.b32.xlu2 %v1117_v2, %s1564_s22 }
0x14c3   :  { %v1121_v3 = vpop.permute.xlu2 %1120 }
0x14c4   :  { %1374 = vmatmul.msk.f32.vlgmr.msrb.gmra.mxu0 %vm310_vm6, %v1121_v3 }
0x1541   :  { %v1141_v26 = vpop.f32.mrf.mxu0 }
0x1542   :  { %v1144_v6 = vadd.f32 %v1141_v26, %v1118_v4 }
0x1544   :  { %v1145_v27 = vmul.f32 %v1144_v6, %v1658_v16 }
0x1546   :  { %1438 = vtanh.f32 %v1145_v27 }
0x154c   :  { %v1439_v28 = vpop.eup %1438 }
0x154d   :  { %v1147_v29 = vmul.f32 %v1439_v28, %v1658_v16 }
0x154f   :  { %v1148_v38 = vadd.f32 %v1147_v29, %v1661_v22 }
0x1551   :  { %1151 = vrot.lane.b32.xlu0 %v1148_v38, %s1563_s3  ;;  %v1149_v41 = vmul.f32 %v1148_v38, %v1111_v7 }
0x15c3   :  { %v1152_v39 = vpop.permute.xlu0 %1151 }
0x15c4   :  { %v1154_v40 = vmul.f32 %v1152_v39, %v1148_v38 }
0x15c6   :  { %1156 = vrot.lane.b32.xlu1 %v1154_v40, %s1564_s22 }
0x1638   :  { %v1157_v30 = vpop.permute.xlu1 %1156 }
0x1639   :  { %v1159_v31 = vadd.f32 %v1157_v30, %v1149_v41 }
0x163b   :  { %1440 = vtanh.f32 %v1159_v31 }
0x1641   :  { %v1441_v32 = vpop.eup %1440 }
0x1642   :  { %1162 = vrot.lane.b32.xlu2 %v1441_v32, %s1563_s3 }
0x169c   :  { %v1163_v33 = vpop.permute.xlu2 %1162 }
0x169d   :  { %v1165_v8 = vmul.f32 %v1163_v33, %v1148_v38 }
0x169f   :  { %1168 = vrot.lane.b32.xlu0 %v1165_v8, %s1564_s22 }
0x1711   :  { %v1169_v34 = vpop.permute.xlu0 %1168 }
0x1712   :  { %1375 = vmatmul.msk.f32.vlgmr.msrb.gmra.mxu1 %vm310_vm6, %v1169_v34 }
0x178f   :  { %v1189_v36 = vpop.f32.mrf.mxu1 }
0x1790   :  { %v1192_v37 = vadd.f32 %v1189_v36, %v1166_v35 }
0x1792   :  { %v1193_v42 = vmul.f32 %v1192_v37, %v1658_v16 }
0x1794   :  { %1442 = vtanh.f32 %v1193_v42 }
0x179a   :  { %v1443_v43 = vpop.eup %1442 }
0x179b   :  { %v1195_v44 = vmul.f32 %v1443_v43, %v1658_v16 }
0x179d   :  { %v1196_v45 = vadd.f32 %v1195_v44, %v1661_v22 }
0x179f   :  { %1199 = vrot.lane.b32.xlu1 %v1196_v45, %s1563_s3  ;;  %v1197_v49 = vmul.f32 %v1196_v45, %v1159_v31 }
0x1811   :  { %v1200_v46 = vpop.permute.xlu1 %1199 }
0x1812   :  { %v1202_v47 = vmul.f32 %v1200_v46, %v1196_v45 }
0x1814   :  { %1204 = vrot.lane.b32.xlu2 %v1202_v47, %s1564_s22 }
0x186e   :  { %v1205_v50 = vpop.permute.xlu2 %1204 }
0x186f   :  { %v1207_v51 = vadd.f32 %v1205_v50, %v1197_v49 }
0x1871   :  { %1444 = vtanh.f32 %v1207_v51 }
0x1877   :  { %v1445_v52 = vpop.eup %1444 }
0x1878   :  { %1210 = vrot.lane.b32.xlu0 %v1445_v52, %s1563_s3 }
0x18ea   :  { %v1211_v53 = vpop.permute.xlu0 %1210 }
0x18eb   :  { %v1213_v54 = vmul.f32 %v1211_v53, %v1196_v45 }
0x18ed   :  { %1216 = vrot.lane.b32.xlu1 %v1213_v54, %s1564_s22 }
0x195f   :  { %v1217_v55 = vpop.permute.xlu1 %1216 }
0x1960   :  { %1376 = vmatmul.msk.f32.vlgmr.msrb.gmra.mxu2 %vm310_vm6, %v1217_v55 }
0x19e3   :  { %v1237_v57 = vpop.f32.mrf.mxu2 }
0x19e4   :  { %v1240_v58 = vadd.f32 %v1237_v57, %v1214_v56 }
0x19e6   :  { %v1241_v59 = vmul.f32 %v1240_v58, %v1658_v16 }
0x19e8   :  { %1446 = vtanh.f32 %v1241_v59 }
0x19ee   :  { %v1447_v60 = vpop.eup %1446 }
0x19ef   :  { %v1243_v61 = vmul.f32 %v1447_v60, %v1658_v16 }
0x19f1   :  { %v1244_v5 = vadd.f32 %v1243_v61, %v1661_v22 }
0x19f3   :  { %1247 = vrot.lane.b32.xlu2 %v1244_v5, %s1563_s3  ;;  %v1245_v11 = vmul.f32 %v1244_v5, %v1207_v51 }
0x1a4d   :  { %v1248_v9 = vpop.permute.xlu2 %1247 }
0x1a4e   :  { %v1250_v10 = vmul.f32 %v1248_v9, %v1244_v5 }
0x1a50   :  { %1252 = vrot.lane.b32.xlu0 %v1250_v10, %s1564_s22 }
0x1ac2   :  { %v1253_v12 = vpop.permute.xlu0 %1252 }
0x1ac3   :  { %v1255_v13 = vadd.f32 %v1253_v12, %v1245_v11 }
0x1ac5   :  { %1448 = vtanh.f32 %v1255_v13 }
0x1acb   :  { %v1449_v14 = vpop.eup %1448 }
0x1acc   :  { %1258 = vrot.lane.b32.xlu1 %v1449_v14, %s1563_s3 }
0x1b3e   :  { %v1259_v15 = vpop.permute.xlu1 %1258 }
0x1b3f   :  { %v1261_v17 = vmul.f32 %v1259_v15, %v1244_v5 }
0x1b41   :  { %1264 = vrot.lane.b32.xlu2 %v1261_v17, %s1564_s22 }
0x1b9b   :  { %v1265_v18 = vpop.permute.xlu2 %1264 }
0x1b9c   :  { %1377 = vmatmul.msk.f32.vlgmr.msrb.gmra.mxu3 %vm310_vm6, %v1265_v18 }
0x1c1f   :  { %v1285_v20 = vpop.f32.mrf.mxu3 }
0x1c20   :  { %v1288_v62 = vadd.f32 %v1285_v20, %v1262_v19 }
0x1c22   :  { %v1289_v63 = vmul.f32 %v1288_v62, %v1658_v16 }
0x1c24   :  { %1450 = vtanh.f32 %v1289_v63 }
0x1c2a   :  { %v1451_v0 = vpop.eup %1450 }
0x1c2b   :  { %v1291_v1 = vmul.f32 %v1451_v0, %v1658_v16 }
0x1c2d   :  { %v1292_v21 = vadd.f32 %v1291_v1, %v1661_v22 }
0x1c2f   :  { %1295 = vrot.lane.b32.xlu0 %v1292_v21, %s1563_s3  ;;  %v1293_v7 = vmul.f32 %v1292_v21, %v1255_v13 }
0x1ca1   :  { %v1296_v23 = vpop.permute.xlu0 %1295 }
0x1ca2   :  { %v1298_v48 = vmul.f32 %v1296_v23, %v1292_v21 }
0x1ca4   :  { %1300 = vrot.lane.b32.xlu1 %v1298_v48, %s1564_s22 }
0x1d16   :  { %v1301_v24 = vpop.permute.xlu1 %1300 }
0x1d17   :  { %v1303_v25 = vadd.f32 %v1301_v24, %v1293_v7 }
0x1d19   :  { %1452 = vtanh.f32 %v1303_v25 }
0x1d1f   :  { %v1453_v2 = vpop.eup %1452 }
0x1d20   :  { %1306 = vrot.lane.b32.xlu2 %v1453_v2, %s1563_s3 }
0x1d7a   :  { %v1307_v3 = vpop.permute.xlu2 %1306 }
0x1d7b   :  { %v1309_v4 = vmul.f32 %v1307_v3, %v1292_v21 }
0x1d7d   :  { %1311 = vrot.lane.b32.xlu0 %v1309_v4, %s1564_s22 }
0x1def   :  { %v1312_v16 = vpop.permute.xlu0 %1311 }
0x1df0   :  { %1314 = vst.msk [vmem:[#allocation10] sm:$0x3] %vm360_vm5, %v1312_v16 }
0x1df1   :  { %1325 = dma.vmem_to_hbm [thread:$0]  %s1321_s13, 32, %s1323_s4, [#allocation6]  }
0x1df2   :  { %1554 = dma.done.wait [#allocation6], 32  }
0x1df3   :  { %1555 = vsyncadd [#allocation6], 4294967264 }
0x1df4   :  { %1330 = vsyncpa [#allocation5], 1 }
0x1df5   :  { %1331 = vsyncpa [#allocation8], 1 }
0x1df6   :  { %1332 = vsyncpa [#allocation6], 1 }

</bundles_post_ra>
